<compile_context>
chip_gen: v7x
topology: tpu7x:2x2x1
jax: 0.10.0
libtpu: 0.0.40
codegen_flags: <defaults>
</compile_context>

<pallas_src>
import jax
import jax.numpy as jnp
import numpy as np
from jax.experimental import pallas as pl
from jax.experimental.pallas import tpu as pltpu

CHAR_EMBED_SIZE = 50
DROPOUT_RATE = 0.3                       # eval-mode: identity (see TODO in kernel)
KERNEL_SIZE = 5
M_WORD = 21
L_OUT = M_WORD - KERNEL_SIZE + 1         # 17 conv output positions
WIN = KERNEL_SIZE * CHAR_EMBED_SIZE      # 250 = contraction width of one conv window
ROW = M_WORD * CHAR_EMBED_SIZE           # 1050 = flattened char-embeddings per word


def _round_up(x, m):
    return ((x + m - 1) // m) * m


def _char_cnn_highway_kernel(x_ref, wconv_ref, bconv_ref, whw_ref, bhw_ref, o_ref):
    """Fused CharCNN (windowed matmuls + max-pool-over-time) + Highway for one N-tile.

    x_ref     : (TN, 1050) bf16   flattened char embeddings of TN words
    wconv_ref : (250, E_pad) bf16 Conv1d weight, rows ordered (k, c), cols zero-padded
    bconv_ref : (1, E_pad) f32
    whw_ref   : (E_pad, 2*E_pad) bf16  [proj | gate] fused Highway weight
    bhw_ref   : (1, 2*E_pad) f32
    o_ref     : (TN, E_pad) f32
    """
    wconv = wconv_ref[...]                                   # stays VMEM/vreg resident
    # Conv1d as one MXU matmul per output position; running max == max-pool-over-time.
    pooled = jnp.dot(x_ref[:, 0:WIN], wconv, preferred_element_type=jnp.float32)
    for t in range(1, L_OUT):
        lo = t * CHAR_EMBED_SIZE                             # static lane offset
        tap = jnp.dot(x_ref[:, lo:lo + WIN], wconv,
                      preferred_element_type=jnp.float32)
        pooled = jnp.maximum(pooled, tap)
    # Bias + ReLU hoisted out of the loop (exact: bias is t-invariant).
    pooled = jnp.maximum(pooled + bconv_ref[...], 0.0)       # (TN, E_pad) f32

    # Highway: single fused [proj | gate] matmul, split on a 128-lane boundary.
    hw = jnp.dot(pooled.astype(jnp.bfloat16), whw_ref[...],
                 preferred_element_type=jnp.float32) + bhw_ref[...]
    e_pad = o_ref.shape[-1]
    proj = jnp.maximum(hw[:, :e_pad], 0.0)
    gate = jax.nn.sigmoid(hw[:, e_pad:])
    out = gate * proj + (1.0 - gate) * pooled
    # TODO(synk): training-mode dropout (rate=0.3) not applied; eval mode == identity.
    o_ref[...] = out.astype(o_ref.dtype)


def model_embeddings_forward(input_tensor, params, *, tile_n=512):
    """input_tensor: (sentence_length, batch_size, M_WORD) int32 char indices.
    Returns (sentence_length, batch_size, embed_size) float32."""
    L, B, M = input_tensor.shape
    assert M == M_WORD
    N = L * B
    e_word = params["w_conv"].shape[1]
    e_pad = _round_up(max(e_word, 128), 128)                 # lane-dense output width

    # Glue: embedding lookup (gather) + flatten per word; bf16 halves kernel input DMA.
    x_emb = jnp.take(params["emb_table"], input_tensor.reshape(-1), axis=0)
    x_emb = x_emb.reshape(N, ROW).astype(jnp.bfloat16)

    tn = min(tile_n, _round_up(N, 16))                       # small inputs: one tile
    n_pad = _round_up(N, tn)
    if n_pad != N:
        x_emb = jnp.pad(x_emb, ((0, n_pad - N), (0, 0)))     # zero rows, sliced off below

    # Pad / fuse weights for clean MXU + lane-dense stores (zero pads keep math exact).
    w_conv = jnp.zeros((WIN, e_pad), jnp.bfloat16).at[:, :e_word].set(
        params["w_conv"].astype(jnp.bfloat16))
    b_conv = jnp.zeros((1, e_pad), jnp.float32).at[:, :e_word].set(params["b_conv"])
    w_hw = jnp.zeros((e_pad, 2 * e_pad), jnp.bfloat16)
    w_hw = w_hw.at[:e_word, :e_word].set(params["w_proj"].astype(jnp.bfloat16))
    w_hw = w_hw.at[:e_word, e_pad:e_pad + e_word].set(params["w_gate"].astype(jnp.bfloat16))
    b_hw = jnp.zeros((1, 2 * e_pad), jnp.float32)
    b_hw = b_hw.at[:, :e_word].set(params["b_proj"])
    b_hw = b_hw.at[:, e_pad:e_pad + e_word].set(params["b_gate"])

    grid = (n_pad // tn,)
    flops = 2 * n_pad * (L_OUT * WIN * e_pad + e_pad * 2 * e_pad)
    bytes_accessed = (x_emb.size * 2 + n_pad * e_pad * 4
                      + w_conv.size * 2 + w_hw.size * 2 + b_conv.size * 4 + b_hw.size * 4)

    out = pl.pallas_call(
        _char_cnn_highway_kernel,
        out_shape=jax.ShapeDtypeStruct((n_pad, e_pad), jnp.float32),
        grid=grid,
        in_specs=[
            pl.BlockSpec((tn, ROW), lambda i: (i, 0)),            # activations: tiled over N
            pl.BlockSpec((WIN, e_pad), lambda i: (0, 0)),          # weights stay resident
            pl.BlockSpec((1, e_pad), lambda i: (0, 0)),
            pl.BlockSpec((e_pad, 2 * e_pad), lambda i: (0, 0)),
            pl.BlockSpec((1, 2 * e_pad), lambda i: (0, 0)),
        ],
        out_specs=pl.BlockSpec((tn, e_pad), lambda i: (i, 0)),
        compiler_params=pltpu.CompilerParams(dimension_semantics=("parallel",)),
        cost_estimate=pl.CostEstimate(
            flops=flops, transcendentals=n_pad * e_pad, bytes_accessed=bytes_accessed),
    )(x_emb, w_conv, b_conv, w_hw, b_hw)

    return out[:N, :e_word].reshape(L, B, e_word)


def init_params(key, vocab_size, embed_size, pad_idx=0):
    ks = jax.random.split(key, 7)
    # nn.Embedding(len(char2id), CHAR_EMBED_SIZE, padding_idx) -> pad row is zero.
    emb = jax.random.normal(ks[0], (vocab_size, CHAR_EMBED_SIZE), jnp.float32)
    emb = emb.at[pad_idx].set(0.0)
    # torch Conv1d weight layout: (out=E_word, in=E_char, K)
    w_conv_t = 0.05 * jax.random.normal(ks[1], (embed_size, CHAR_EMBED_SIZE, KERNEL_SIZE), jnp.float32)
    b_conv = 0.05 * jax.random.normal(ks[2], (embed_size,), jnp.float32)
    # flatten to windowed layout: W_flat[k*E_char + c, e] = W_torch[e, c, k]
    w_conv = jnp.transpose(w_conv_t, (2, 1, 0)).reshape(KERNEL_SIZE * CHAR_EMBED_SIZE, embed_size)
    # torch Linear weights: (out, in); kernel wants (in, out)
    w_proj_t = 0.05 * jax.random.normal(ks[3], (embed_size, embed_size), jnp.float32)
    b_proj = 0.05 * jax.random.normal(ks[4], (embed_size,), jnp.float32)
    w_gate_t = 0.05 * jax.random.normal(ks[5], (embed_size, embed_size), jnp.float32)
    b_gate = 0.05 * jax.random.normal(ks[6], (embed_size,), jnp.float32)
    return dict(
        emb_table=emb,
        w_conv=w_conv, b_conv=b_conv.reshape(1, embed_size),
        w_proj=w_proj_t.T, b_proj=b_proj.reshape(1, embed_size),
        w_gate=w_gate_t.T, b_gate=b_gate.reshape(1, embed_size),
    )


def reference_forward(input_tensor, params, *, mxu_dtype=jnp.float32):
    """Pure-JAX reference matching the PyTorch semantics (eval mode).
    mxu_dtype=bf16 emulates the kernel's matmul-input precision for a tight check."""
    L, B, M = input_tensor.shape
    N = L * B
    x_emb = jnp.take(params["emb_table"], input_tensor.reshape(-1), axis=0)
    x_emb = x_emb.reshape(N, M, CHAR_EMBED_SIZE)
    taps = jnp.stack(
        [x_emb[:, t:t + KERNEL_SIZE, :].reshape(N, -1) for t in range(L_OUT)], axis=1)
    conv = jnp.einsum("ntk,ke->nte", taps.astype(mxu_dtype),
                      params["w_conv"].astype(mxu_dtype),
                      preferred_element_type=jnp.float32) + params["b_conv"][None]
    conv = jnp.maximum(conv, 0.0)
    pooled = conv.max(axis=1)
    pooled_m = pooled.astype(mxu_dtype)
    proj = jnp.maximum(
        jnp.dot(pooled_m, params["w_proj"].astype(mxu_dtype),
                preferred_element_type=jnp.float32) + params["b_proj"], 0.0)
    gate = jax.nn.sigmoid(
        jnp.dot(pooled_m, params["w_gate"].astype(mxu_dtype),
                preferred_element_type=jnp.float32) + params["b_gate"])
    out = gate * proj + (1.0 - gate) * pooled
    return out.reshape(L, B, -1)


if __name__ == "__main__":
    embed_size = 32      # self.embed_size
    vocab_size = 30      # len(vocab.char2id)
    sent_len, batch = 8, 2

    key = jax.random.PRNGKey(0)
    k_param, k_inp = jax.random.split(key)
    params = init_params(k_param, vocab_size, embed_size, pad_idx=0)
    input_tensor = jax.random.randint(
        k_inp, (sent_len, batch, M_WORD), 0, vocab_size, dtype=jnp.int32)

    out = jax.block_until_ready(model_embeddings_forward(input_tensor, params))
    assert out.shape == (sent_len, batch, embed_size)

    # Tight check vs. a bf16-matmul-emulating reference (same precision as the kernel).
    ref_bf16 = reference_forward(input_tensor, params, mxu_dtype=jnp.bfloat16)
    np.testing.assert_allclose(np.asarray(out), np.asarray(ref_bf16), rtol=2e-3, atol=2e-3)
    # Loose check vs. the pure-f32 PyTorch-equivalent reference.
    ref_f32 = reference_forward(input_tensor, params)
    np.testing.assert_allclose(np.asarray(out), np.asarray(ref_f32), rtol=3e-2, atol=3e-2)

    print("KERNEL_OK")
</pallas_src>

<mosaic_0001>
module attributes {stable_mosaic.version = 11 : i64} {
  func.func @_char_cnn_highway_kernel(%arg0: i32, %arg1: memref<16x1050xbf16, #tpu.memory_space<vmem>>, %arg2: memref<250x128xbf16, #tpu.memory_space<vmem>>, %arg3: memref<1x128xf32, #tpu.memory_space<vmem>>, %arg4: memref<128x256xbf16, #tpu.memory_space<vmem>>, %arg5: memref<1x256xf32, #tpu.memory_space<vmem>>, %arg6: memref<16x128xf32, #tpu.memory_space<vmem>>) attributes {dimension_semantics = [#tpu.dimension_semantics<parallel>], iteration_bounds = array<i64: 1>, scalar_prefetch = 0 : i64, scratch_operands = 0 : i64, tpu.core_type = #tpu.core_type<tc>, window_params = [{transform_indices = @transform_0, window_bounds = array<i64: 16, 1050>}, {pipeline_mode = #tpu.pipeline_mode<synchronous>, transform_indices = @transform_1, window_bounds = array<i64: 250, 128>}, {pipeline_mode = #tpu.pipeline_mode<synchronous>, transform_indices = @transform_2, window_bounds = array<i64: 1, 128>}, {pipeline_mode = #tpu.pipeline_mode<synchronous>, transform_indices = @transform_3, window_bounds = array<i64: 128, 256>}, {pipeline_mode = #tpu.pipeline_mode<synchronous>, transform_indices = @transform_4, window_bounds = array<i64: 1, 256>}, {transform_indices = @transform_5, window_bounds = array<i64: 16, 128>}]} {
    %c0 = arith.constant 0 : index
    %c0_0 = arith.constant 0 : index
    %0 = vector.load %arg2[%c0, %c0_0] : memref<250x128xbf16, #tpu.memory_space<vmem>>, vector<250x128xbf16>
    %c0_1 = arith.constant 0 : index
    %c0_2 = arith.constant 0 : index
    %1 = vector.load %arg1[%c0_1, %c0_2] : memref<16x1050xbf16, #tpu.memory_space<vmem>>, vector<16x250xbf16>
    %cst = arith.constant dense<0.000000e+00> : vector<16x128xf32>
    %2 = tpu.matmul %1, %0, %cst {dimension_numbers = #tpu.dot_dimension_numbers<[1], [0], [0], [1], [0, 0, 1, 1], [], []>} : vector<16x250xbf16>, vector<250x128xbf16>, vector<16x128xf32> -> vector<16x128xf32>
    %c0_3 = arith.constant 0 : index
    %c50 = arith.constant 50 : index
    %3 = vector.load %arg1[%c0_3, %c50] : memref<16x1050xbf16, #tpu.memory_space<vmem>>, vector<16x250xbf16>
    %cst_4 = arith.constant dense<0.000000e+00> : vector<16x128xf32>
    %4 = tpu.matmul %3, %0, %cst_4 {dimension_numbers = #tpu.dot_dimension_numbers<[1], [0], [0], [1], [0, 0, 1, 1], [], []>} : vector<16x250xbf16>, vector<250x128xbf16>, vector<16x128xf32> -> vector<16x128xf32>
    %5 = arith.maximumf %2, %4 : vector<16x128xf32>
    %c0_5 = arith.constant 0 : index
    %c100 = arith.constant 100 : index
    %6 = vector.load %arg1[%c0_5, %c100] : memref<16x1050xbf16, #tpu.memory_space<vmem>>, vector<16x250xbf16>
    %cst_6 = arith.constant dense<0.000000e+00> : vector<16x128xf32>
    %7 = tpu.matmul %6, %0, %cst_6 {dimension_numbers = #tpu.dot_dimension_numbers<[1], [0], [0], [1], [0, 0, 1, 1], [], []>} : vector<16x250xbf16>, vector<250x128xbf16>, vector<16x128xf32> -> vector<16x128xf32>
    %8 = arith.maximumf %5, %7 : vector<16x128xf32>
    %c0_7 = arith.constant 0 : index
    %c150 = arith.constant 150 : index
    %9 = vector.load %arg1[%c0_7, %c150] : memref<16x1050xbf16, #tpu.memory_space<vmem>>, vector<16x250xbf16>
    %cst_8 = arith.constant dense<0.000000e+00> : vector<16x128xf32>
    %10 = tpu.matmul %9, %0, %cst_8 {dimension_numbers = #tpu.dot_dimension_numbers<[1], [0], [0], [1], [0, 0, 1, 1], [], []>} : vector<16x250xbf16>, vector<250x128xbf16>, vector<16x128xf32> -> vector<16x128xf32>
    %11 = arith.maximumf %8, %10 : vector<16x128xf32>
    %c0_9 = arith.constant 0 : index
    %c200 = arith.constant 200 : index
    %12 = vector.load %arg1[%c0_9, %c200] : memref<16x1050xbf16, #tpu.memory_space<vmem>>, vector<16x250xbf16>
    %cst_10 = arith.constant dense<0.000000e+00> : vector<16x128xf32>
    %13 = tpu.matmul %12, %0, %cst_10 {dimension_numbers = #tpu.dot_dimension_numbers<[1], [0], [0], [1], [0, 0, 1, 1], [], []>} : vector<16x250xbf16>, vector<250x128xbf16>, vector<16x128xf32> -> vector<16x128xf32>
    %14 = arith.maximumf %11, %13 : vector<16x128xf32>
    %c0_11 = arith.constant 0 : index
    %c250 = arith.constant 250 : index
    %15 = vector.load %arg1[%c0_11, %c250] : memref<16x1050xbf16, #tpu.memory_space<vmem>>, vector<16x250xbf16>
    %cst_12 = arith.constant dense<0.000000e+00> : vector<16x128xf32>
    %16 = tpu.matmul %15, %0, %cst_12 {dimension_numbers = #tpu.dot_dimension_numbers<[1], [0], [0], [1], [0, 0, 1, 1], [], []>} : vector<16x250xbf16>, vector<250x128xbf16>, vector<16x128xf32> -> vector<16x128xf32>
    %17 = arith.maximumf %14, %16 : vector<16x128xf32>
    %c0_13 = arith.constant 0 : index
    %c300 = arith.constant 300 : index
    %18 = vector.load %arg1[%c0_13, %c300] : memref<16x1050xbf16, #tpu.memory_space<vmem>>, vector<16x250xbf16>
    %cst_14 = arith.constant dense<0.000000e+00> : vector<16x128xf32>
    %19 = tpu.matmul %18, %0, %cst_14 {dimension_numbers = #tpu.dot_dimension_numbers<[1], [0], [0], [1], [0, 0, 1, 1], [], []>} : vector<16x250xbf16>, vector<250x128xbf16>, vector<16x128xf32> -> vector<16x128xf32>
    %20 = arith.maximumf %17, %19 : vector<16x128xf32>
    %c0_15 = arith.constant 0 : index
    %c350 = arith.constant 350 : index
    %21 = vector.load %arg1[%c0_15, %c350] : memref<16x1050xbf16, #tpu.memory_space<vmem>>, vector<16x250xbf16>
    %cst_16 = arith.constant dense<0.000000e+00> : vector<16x128xf32>
    %22 = tpu.matmul %21, %0, %cst_16 {dimension_numbers = #tpu.dot_dimension_numbers<[1], [0], [0], [1], [0, 0, 1, 1], [], []>} : vector<16x250xbf16>, vector<250x128xbf16>, vector<16x128xf32> -> vector<16x128xf32>
    %23 = arith.maximumf %20, %22 : vector<16x128xf32>
    %c0_17 = arith.constant 0 : index
    %c400 = arith.constant 400 : index
    %24 = vector.load %arg1[%c0_17, %c400] : memref<16x1050xbf16, #tpu.memory_space<vmem>>, vector<16x250xbf16>
    %cst_18 = arith.constant dense<0.000000e+00> : vector<16x128xf32>
    %25 = tpu.matmul %24, %0, %cst_18 {dimension_numbers = #tpu.dot_dimension_numbers<[1], [0], [0], [1], [0, 0, 1, 1], [], []>} : vector<16x250xbf16>, vector<250x128xbf16>, vector<16x128xf32> -> vector<16x128xf32>
    %26 = arith.maximumf %23, %25 : vector<16x128xf32>
    %c0_19 = arith.constant 0 : index
    %c450 = arith.constant 450 : index
    %27 = vector.load %arg1[%c0_19, %c450] : memref<16x1050xbf16, #tpu.memory_space<vmem>>, vector<16x250xbf16>
    %cst_20 = arith.constant dense<0.000000e+00> : vector<16x128xf32>
    %28 = tpu.matmul %27, %0, %cst_20 {dimension_numbers = #tpu.dot_dimension_numbers<[1], [0], [0], [1], [0, 0, 1, 1], [], []>} : vector<16x250xbf16>, vector<250x128xbf16>, vector<16x128xf32> -> vector<16x128xf32>
    %29 = arith.maximumf %26, %28 : vector<16x128xf32>
    %c0_21 = arith.constant 0 : index
    %c500 = arith.constant 500 : index
    %30 = vector.load %arg1[%c0_21, %c500] : memref<16x1050xbf16, #tpu.memory_space<vmem>>, vector<16x250xbf16>
    %cst_22 = arith.constant dense<0.000000e+00> : vector<16x128xf32>
    %31 = tpu.matmul %30, %0, %cst_22 {dimension_numbers = #tpu.dot_dimension_numbers<[1], [0], [0], [1], [0, 0, 1, 1], [], []>} : vector<16x250xbf16>, vector<250x128xbf16>, vector<16x128xf32> -> vector<16x128xf32>
    %32 = arith.maximumf %29, %31 : vector<16x128xf32>
    %c0_23 = arith.constant 0 : index
    %c550 = arith.constant 550 : index
    %33 = vector.load %arg1[%c0_23, %c550] : memref<16x1050xbf16, #tpu.memory_space<vmem>>, vector<16x250xbf16>
    %cst_24 = arith.constant dense<0.000000e+00> : vector<16x128xf32>
    %34 = tpu.matmul %33, %0, %cst_24 {dimension_numbers = #tpu.dot_dimension_numbers<[1], [0], [0], [1], [0, 0, 1, 1], [], []>} : vector<16x250xbf16>, vector<250x128xbf16>, vector<16x128xf32> -> vector<16x128xf32>
    %35 = arith.maximumf %32, %34 : vector<16x128xf32>
    %c0_25 = arith.constant 0 : index
    %c600 = arith.constant 600 : index
    %36 = vector.load %arg1[%c0_25, %c600] : memref<16x1050xbf16, #tpu.memory_space<vmem>>, vector<16x250xbf16>
    %cst_26 = arith.constant dense<0.000000e+00> : vector<16x128xf32>
    %37 = tpu.matmul %36, %0, %cst_26 {dimension_numbers = #tpu.dot_dimension_numbers<[1], [0], [0], [1], [0, 0, 1, 1], [], []>} : vector<16x250xbf16>, vector<250x128xbf16>, vector<16x128xf32> -> vector<16x128xf32>
    %38 = arith.maximumf %35, %37 : vector<16x128xf32>
    %c0_27 = arith.constant 0 : index
    %c650 = arith.constant 650 : index
    %39 = vector.load %arg1[%c0_27, %c650] : memref<16x1050xbf16, #tpu.memory_space<vmem>>, vector<16x250xbf16>
    %cst_28 = arith.constant dense<0.000000e+00> : vector<16x128xf32>
    %40 = tpu.matmul %39, %0, %cst_28 {dimension_numbers = #tpu.dot_dimension_numbers<[1], [0], [0], [1], [0, 0, 1, 1], [], []>} : vector<16x250xbf16>, vector<250x128xbf16>, vector<16x128xf32> -> vector<16x128xf32>
    %41 = arith.maximumf %38, %40 : vector<16x128xf32>
    %c0_29 = arith.constant 0 : index
    %c700 = arith.constant 700 : index
    %42 = vector.load %arg1[%c0_29, %c700] : memref<16x1050xbf16, #tpu.memory_space<vmem>>, vector<16x250xbf16>
    %cst_30 = arith.constant dense<0.000000e+00> : vector<16x128xf32>
    %43 = tpu.matmul %42, %0, %cst_30 {dimension_numbers = #tpu.dot_dimension_numbers<[1], [0], [0], [1], [0, 0, 1, 1], [], []>} : vector<16x250xbf16>, vector<250x128xbf16>, vector<16x128xf32> -> vector<16x128xf32>
    %44 = arith.maximumf %41, %43 : vector<16x128xf32>
    %c0_31 = arith.constant 0 : index
    %c750 = arith.constant 750 : index
    %45 = vector.load %arg1[%c0_31, %c750] : memref<16x1050xbf16, #tpu.memory_space<vmem>>, vector<16x250xbf16>
    %cst_32 = arith.constant dense<0.000000e+00> : vector<16x128xf32>
    %46 = tpu.matmul %45, %0, %cst_32 {dimension_numbers = #tpu.dot_dimension_numbers<[1], [0], [0], [1], [0, 0, 1, 1], [], []>} : vector<16x250xbf16>, vector<250x128xbf16>, vector<16x128xf32> -> vector<16x128xf32>
    %47 = arith.maximumf %44, %46 : vector<16x128xf32>
    %c0_33 = arith.constant 0 : index
    %c800 = arith.constant 800 : index
    %48 = vector.load %arg1[%c0_33, %c800] : memref<16x1050xbf16, #tpu.memory_space<vmem>>, vector<16x250xbf16>
    %cst_34 = arith.constant dense<0.000000e+00> : vector<16x128xf32>
    %49 = tpu.matmul %48, %0, %cst_34 {dimension_numbers = #tpu.dot_dimension_numbers<[1], [0], [0], [1], [0, 0, 1, 1], [], []>} : vector<16x250xbf16>, vector<250x128xbf16>, vector<16x128xf32> -> vector<16x128xf32>
    %50 = arith.maximumf %47, %49 : vector<16x128xf32>
    %c0_35 = arith.constant 0 : index
    %c0_36 = arith.constant 0 : index
    %51 = vector.load %arg3[%c0_35, %c0_36] : memref<1x128xf32, #tpu.memory_space<vmem>>, vector<1x128xf32>
    %52 = vector.broadcast %51 : vector<1x128xf32> to vector<16x128xf32>
    %53 = arith.addf %50, %52 : vector<16x128xf32>
    %cst_37 = arith.constant 0.000000e+00 : f32
    %54 = vector.broadcast %cst_37 : f32 to vector<16x128xf32>
    %55 = arith.maximumf %53, %54 : vector<16x128xf32>
    %56 = arith.truncf %55 : vector<16x128xf32> to vector<16x128xbf16>
    %c0_38 = arith.constant 0 : index
    %c0_39 = arith.constant 0 : index
    %57 = vector.load %arg4[%c0_38, %c0_39] : memref<128x256xbf16, #tpu.memory_space<vmem>>, vector<128x256xbf16>
    %cst_40 = arith.constant dense<0.000000e+00> : vector<16x256xf32>
    %58 = tpu.matmul %56, %57, %cst_40 {dimension_numbers = #tpu.dot_dimension_numbers<[1], [0], [0], [1], [0, 0, 1, 1], [], []>} : vector<16x128xbf16>, vector<128x256xbf16>, vector<16x256xf32> -> vector<16x256xf32>
    %c0_41 = arith.constant 0 : index
    %c0_42 = arith.constant 0 : index
    %59 = vector.load %arg5[%c0_41, %c0_42] : memref<1x256xf32, #tpu.memory_space<vmem>>, vector<1x256xf32>
    %60 = vector.broadcast %59 : vector<1x256xf32> to vector<16x256xf32>
    %61 = arith.addf %58, %60 : vector<16x256xf32>
    %62 = vector.extract_strided_slice %61 {offsets = [0, 0], sizes = [16, 128], strides = [1, 1]} : vector<16x256xf32> to vector<16x128xf32>
    %cst_43 = arith.constant 0.000000e+00 : f32
    %63 = vector.broadcast %cst_43 : f32 to vector<16x128xf32>
    %64 = arith.maximumf %62, %63 : vector<16x128xf32>
    %65 = vector.extract_strided_slice %61 {offsets = [0, 128], sizes = [16, 128], strides = [1, 1]} : vector<16x256xf32> to vector<16x128xf32>
    %66 = arith.negf %65 : vector<16x128xf32>
    %67 = math.exp %66 : vector<16x128xf32>
    %cst_44 = arith.constant 1.000000e+00 : f32
    %68 = vector.broadcast %cst_44 : f32 to vector<16x128xf32>
    %69 = arith.addf %68, %67 : vector<16x128xf32>
    %70 = arith.divf %68, %69 : vector<16x128xf32>
    %71 = arith.mulf %70, %64 : vector<16x128xf32>
    %cst_45 = arith.constant 1.000000e+00 : f32
    %72 = vector.broadcast %cst_45 : f32 to vector<16x128xf32>
    %73 = arith.subf %72, %70 : vector<16x128xf32>
    %74 = arith.mulf %73, %55 : vector<16x128xf32>
    %75 = arith.addf %71, %74 : vector<16x128xf32>
    %c0_46 = arith.constant 0 : index
    %c0_47 = arith.constant 0 : index
    %76 = vector.load %arg6[%c0_46, %c0_47] : memref<16x128xf32, #tpu.memory_space<vmem>>, vector<16x128xf32>
    tpu.vector_store %arg6[%c0_46, %c0_47], %75 {strides = array<i32>} : memref<16x128xf32, #tpu.memory_space<vmem>>, vector<16x128xf32>,
    return
  }
  func.func @transform_0(%arg0: i32) -> (i32, i32) {
    %c0_i32 = arith.constant 0 : i32
    %c0_i32_0 = arith.constant 0 : i32
    return %arg0, %c0_i32 : i32, i32
  }
  func.func @transform_1(%arg0: i32) -> (i32, i32) {
    %c0_i32 = arith.constant 0 : i32
    %c0_i32_0 = arith.constant 0 : i32
    %c0_i32_1 = arith.constant 0 : i32
    return %c0_i32, %c0_i32_0 : i32, i32
  }
  func.func @transform_2(%arg0: i32) -> (i32, i32) {
    %c0_i32 = arith.constant 0 : i32
    %c0_i32_0 = arith.constant 0 : i32
    %c0_i32_1 = arith.constant 0 : i32
    return %c0_i32, %c0_i32_0 : i32, i32
  }
  func.func @transform_3(%arg0: i32) -> (i32, i32) {
    %c0_i32 = arith.constant 0 : i32
    %c0_i32_0 = arith.constant 0 : i32
    %c0_i32_1 = arith.constant 0 : i32
    return %c0_i32, %c0_i32_0 : i32, i32
  }
  func.func @transform_4(%arg0: i32) -> (i32, i32) {
    %c0_i32 = arith.constant 0 : i32
    %c0_i32_0 = arith.constant 0 : i32
    %c0_i32_1 = arith.constant 0 : i32
    return %c0_i32, %c0_i32_0 : i32, i32
  }
  func.func @transform_5(%arg0: i32) -> (i32, i32) {
    %c0_i32 = arith.constant 0 : i32
    %c0_i32_0 = arith.constant 0 : i32
    return %arg0, %c0_i32 : i32, i32
  }
}

</mosaic_0001>

<bundles_post_ra>
// kernel: tpu_custom_call.1
= control target key start
LH: loop header
LB: loop body
LE: loop exit
PB: predicated region body
PF: predicated region fallthrough
CT: control target
= control target key end

     0   :  { %10 = vsyncpa [#allocation3], 0  ;;  %s2649_s0 = inlined_call_operand.hbm [shape: bf16[16,1050], index: 0, kind: input, shape index: {}]   ;;  %s2650_s1 = inlined_call_operand.hbm [shape: bf16[250,128], index: 1, kind: input, shape index: {}]   ;;  %s2651_s2 = inlined_call_operand.vmem [shape: f32[1,128], index: 2, kind: input, shape index: {}]   ;;  %s2652_s3 = inlined_call_operand.hbm [shape: bf16[128,256], index: 3, kind: input, shape index: {}]   ;;  %s2653_s4 = inlined_call_operand.vmem [shape: f32[1,256], index: 4, kind: input, shape index: {}]   ;;  %s2654_s5 = inlined_call_operand.hbm [shape: f32[16,128], index: 5, kind: output, shape index: {}]  }
   0x1   :  { %11 = vsyncpa [#allocation6], 0 }
   0x2   :  { %12 = vsyncpa [#allocation4], 0  ;;  %s2139_s18 = smov [#allocation5]   ;;  %s2045_s22 = scalar_lea.hbm %s2650_s1, 2048 }
   0x3   :  { %s30_s19 = sshll.u32 %s2139_s18, 4  ;;  %p2046_p0 = scmp.ne.s32.totalorder %s2650_s1, %s2045_s22  ;;  %s31_s19 = int_to_ptr.vmem [resolvable:$true] %s30_s19 }
   0x4   :  { %p2049_p1 = scmp.lt.u32.totalorder %s2045_s22, %s2650_s1 }
   0x6   :  { %p2051_p2 = pnand %p2049_p1, %p2046_p0 }
   0x8   :  { %2054 = shalt.err (!%p2051_p2)
}
   0x9   :  { %s2055_s27 = scalar_lea.vmem %s31_s19, 2048  ;;  %p2060_p4 = scmp.lt.s32.totalorder %s31_s19, %s31_s19 }
   0xa   :  { %p2056_p3 = scmp.ne.s32.totalorder %s31_s19, %s2055_s27  ;;  %p2061_p5 = scmp.lt.s32.totalorder %s2055_s27, %s2055_s27 }
   0xc   :  { %p2062_p6 = por %p2061_p5, %p2060_p4 }
   0xe   :  { %p2063_p7 = pnand %p2062_p6, %p2056_p3 }
  0x10   :  { %2066 = shalt.err (!%p2063_p7)
}
  0x11   :  { %s2140_s28 = smov 64   ;;  %s2141_s29 = smov 4  }
  0x12   :  { %36 = dma.hbm_to_vmem [thread:$0]  %s2650_s1, 2048, %s31_s19, [#allocation6], %s2140_s28, %s2140_s28, %s2141_s29  }
  0x13   :  { %s2142_s7 = smov [#allocation2]   ;;  %s2067_s11 = scalar_lea.hbm %s2649_s0, 1152 }
  0x14   :  { %s18_s8 = sshll.u32 %s2142_s7, 4  ;;  %p2068_p8 = scmp.ne.s32.totalorder %s2649_s0, %s2067_s11  ;;  %s19_s8 = int_to_ptr.vmem [resolvable:$true] %s18_s8 }
  0x15   :  { %p2071_p9 = scmp.lt.u32.totalorder %s2067_s11, %s2649_s0 }
  0x17   :  { %p2073_p10 = pnand %p2071_p9, %p2068_p8 }
  0x19   :  { %2076 = shalt.err (!%p2073_p10)
}
  0x1a   :  { %s2077_s16 = scalar_lea.vmem %s19_s8, 1152  ;;  %p2082_p12 = scmp.lt.s32.totalorder %s19_s8, %s19_s8 }
  0x1b   :  { %p2078_p11 = scmp.ne.s32.totalorder %s19_s8, %s2077_s16  ;;  %p2083_p13 = scmp.lt.s32.totalorder %s2077_s16, %s2077_s16 }
  0x1d   :  { %p2084_p0 = por %p2083_p13, %p2082_p12 }
  0x1f   :  { %p2085_p1 = pnand %p2084_p0, %p2078_p11 }
  0x21   :  { %2088 = shalt.err (!%p2085_p1)
}
  0x22   :  { %s2143_s1 = smov 576   ;;  %s2144_s17 = smov 36  }
  0x23   :  { %24 = dma.hbm_to_vmem [thread:$0]  %s2649_s0, 1152, %s19_s8, [#allocation3], %s2143_s1, %s2143_s1, %s2144_s17  }
  0x24   :  { %s2145_s20 = smov [#allocation7]   ;;  %s2089_s24 = scalar_lea.hbm %s2652_s3, 2048 }
  0x25   :  { %s44_s21 = sshll.u32 %s2145_s20, 4  ;;  %p2090_p2 = scmp.ne.s32.totalorder %s2652_s3, %s2089_s24  ;;  %s45_s21 = int_to_ptr.vmem [resolvable:$true] %s44_s21 }
  0x26   :  { %p2093_p3 = scmp.lt.u32.totalorder %s2089_s24, %s2652_s3 }
  0x28   :  { %p2095_p4 = pnand %p2093_p3, %p2090_p2 }
  0x2a   :  { %2098 = shalt.err (!%p2095_p4)
}
  0x2b   :  { %s2099_s29 = scalar_lea.vmem %s45_s21, 2048  ;;  %p2104_p6 = scmp.lt.s32.totalorder %s45_s21, %s45_s21 }
  0x2c   :  { %p2100_p5 = scmp.ne.s32.totalorder %s45_s21, %s2099_s29  ;;  %p2105_p7 = scmp.lt.s32.totalorder %s2099_s29, %s2099_s29 }
  0x2e   :  { %p2106_p8 = por %p2105_p7, %p2104_p6 }
  0x30   :  { %p2107_p9 = pnand %p2106_p8, %p2100_p5 }
  0x32   :  { %2110 = shalt.err (!%p2107_p9)
}
  0x33   :  { %s2146_s0 = smov 128   ;;  %s2147_s30 = smov 8  }
  0x34   :  { %50 = dma.hbm_to_vmem [thread:$0]  %s2652_s3, 2048, %s45_s21, [#allocation6], %s2146_s0, %s2146_s0, %s2147_s30  }
  0x35   :  { %2133 = dma.done.wait [#allocation3], 1152  }
  0x36   :  { %2134 = vsyncadd [#allocation3], 4294966144 }
  0x37   :  { %2135 = dma.done.wait [#allocation6], 4096  }
  0x38   :  { %2136 = vsyncadd [#allocation6], 4294963200  ;;  %vm201_vm0 = vcmask 998400   ;;  %v1963_v0 = vld [vmem:[#allocation2 + $0x4] ss:$36 sps:$4 sm:$0xff]   ;;  %s2148_s8 = smov 78  }
  0x39   :  { %v2235_v1 = vld [vmem:[#allocation2] ss:$36 sps:$4 sm:$0xff]   ;;  %269 = vrot.lane.b32.xlu0 %v1963_v0, %s2148_s8  ;;  %v1966_v2 = vld [vmem:[#allocation2 + $0x8] ss:$36 sps:$4 sm:$0xff]   ;;  %1488 = vmatprep.mubr.msk.bf16.mxu0 %vm201_vm0, %v1963_v0  ;;  %s2149_s3 = smov 28   ;;  %v2244_v5 = vld [vmem:[#allocation5 + $0x48] sm:$0xff]  }
  0x3a   :  { %267 = vrot.lane.b32.xlu1 %v2235_v1, %s2148_s8  ;;  %v2239_v3 = vld [vmem:[#allocation5 + $0x40] sm:$0xff]   ;;  %v2247_v6 = vld [vmem:[#allocation5 + $0x8] sm:$0xff]   ;;  %v2252_v8 = vld [vmem:[#allocation5 + $0x50] sm:$0xff]   ;;  %s2150_s9 = smov 106   ;;  %s2151_s10 = smov 56   ;;  %vm205_vm1 = vcmask 1044480  }
  0x3b   :  { %v2241_v4 = vld [vmem:[#allocation5] sm:$0xff]   ;;  %1545 = vmatprep.subr.bf16.mxu0 %v2239_v3  ;;  %1567 = vmatprep.subr.bf16.mxu1 %v2239_v3  ;;  %v2257_v10 = vld [vmem:[#allocation5 + $0x10] sm:$0xff]   ;;  %v2260_v11 = vld [vmem:[#allocation5 + $0x58] sm:$0xff]   ;;  %s2152_s11 = smov 6   ;;  %s2153_s12 = smov 84   ;;  %vm273_vm2 = vcmask 637952  }
  0x3c   :  { %1546 = vmatpush3.bf16.msra.mxu0 %v2241_v4  ;;  %v1967_v7 = vld [vmem:[#allocation2 + $0x8] ss:$36 sps:$4 sm:$0xff]   ;;  %1568 = vmatpush3.bf16.msra.mxu1 %v2241_v4  ;;  %v2265_v13 = vld [vmem:[#allocation5 + $0x18] sm:$0xff]   ;;  %v2276_v16 = vld [vmem:[#allocation5 + $0x68] sm:$0xff]   ;;  %s2154_s13 = smov 34   ;;  %s2155_s14 = smov 112  }
  0x3d   :  { %271 = vrot.lane.b32.xlu0 %v1966_v2, %s2148_s8  ;;  %1547 = vmatprep.subr.bf16.mxu0 %v2244_v5  ;;  %v1969_v9 = vld [vmem:[#allocation2 + $0xc] ss:$36 sps:$4 sm:$0xff]   ;;  %v1970_v12 = vld [vmem:[#allocation2 + $0x4] ss:$36 sps:$4 sm:$0xff]   ;;  %v2284_v19 = vld [vmem:[#allocation5 + $0x70] sm:$0xff]   ;;  %s2156_s15 = smov 62  }
  0x3e   :  { %325 = vrot.lane.b32.xlu1 %v1963_v0, %s2149_s3  ;;  %1569 = vmatprep.subr.bf16.mxu1 %v2244_v5  ;;  %v2268_v14 = vld [vmem:[#allocation5 + $0x60] sm:$0xff]   ;;  %v2281_v17 = vld [vmem:[#allocation5 + $0x28] sm:$0xff]   ;;  %v2287_v20 = vld [vmem:[#allocation5 + $0x30] sm:$0xff]   ;;  %s2157_s16 = smov 12   ;;  %s2158_s1 = smov 90   ;;  %vm329_vm3 = vcmask 228352  }
  0x3f   :  { %v2273_v15 = vld [vmem:[#allocation5 + $0x20] sm:$0xff]   ;;  %v1979_v21 = vld [vmem:[#allocation2 + $0x10] ss:$36 sps:$4 sm:$0xff]   ;;  %v2291_v22 = vld [vmem:[#allocation5 + $0x78] sm:$0x1f]   ;;  %s2159_s17 = smov 40  }
  0x40   :  { %1548 = vmatpush3.bf16.msra.mxu0 %v2247_v6  ;;  %1570 = vmatpush3.bf16.msra.mxu1 %v2247_v6  ;;  %v1975_v18 = vld [vmem:[#allocation2 + $0xc] ss:$36 sps:$4 sm:$0xff]   ;;  %v2297_v24 = vld [vmem:[#allocation5 + $0x38] sm:$0xff]   ;;  %v1993_v26 = vld [vmem:[#allocation2 + $0x14] ss:$36 sps:$4 sm:$0xff]   ;;  %s2160_s18 = smov 118  }
  0x41   :  { %327 = vrot.lane.b32.xlu0 %v1966_v2, %s2149_s3  ;;  %1549 = vmatprep.subr.bf16.mxu0 %v2252_v8  ;;  %v1980_v23 = vld [vmem:[#allocation2 + $0x8] ss:$36 sps:$4 sm:$0xff]   ;;  %v1991_v25 = vld [vmem:[#allocation2 + $0x10] ss:$36 sps:$4 sm:$0xff]   ;;  %v1997_v29 = vld [vmem:[#allocation2 + $0x18] ss:$36 sps:$4 sm:$0xff]  }
  0x42   :  { %323 = vrot.lane.b32.xlu1 %v2235_v1, %s2149_s3  ;;  %1571 = vmatprep.subr.bf16.mxu1 %v2252_v8  ;;  %v1994_v27 = vld [vmem:[#allocation2 + $0xc] ss:$36 sps:$4 sm:$0xff]   ;;  %v1995_v28 = vld [vmem:[#allocation2 + $0x14] ss:$36 sps:$4 sm:$0xff]   ;;  %v2001_v32 = vld [vmem:[#allocation2 + $0x1c] ss:$36 sps:$4 sm:$0xff]  }
  0x43   :  { %v1998_v30 = vld [vmem:[#allocation2 + $0x10] ss:$36 sps:$4 sm:$0xff]   ;;  %v1999_v31 = vld [vmem:[#allocation2 + $0x18] ss:$36 sps:$4 sm:$0xff]   ;;  %s2161_s19 = smov 68   ;;  %s2162_s20 = smov 18  }
  0x44   :  { %1550 = vmatpush3.bf16.msra.mxu0 %v2257_v10  ;;  %1572 = vmatpush3.bf16.msra.mxu1 %v2257_v10  ;;  %v2002_v33 = vld [vmem:[#allocation2 + $0x14] ss:$36 sps:$4 sm:$0xff]   ;;  %v2003_v34 = vld [vmem:[#allocation2 + $0x1c] ss:$36 sps:$4 sm:$0xff]   ;;  %s2163_s21 = smov 96   ;;  %vm402_vm4 = vcmask 867328  }
  0x45   :  { %398 = vrot.lane.b32.xlu0 %v1967_v7, %s2150_s9  ;;  %1551 = vmatprep.subr.bf16.mxu0 %v2260_v11  ;;  %v2005_v35 = vld [vmem:[#allocation2 + $0x20] ss:$36 sps:$4 sm:$0xff]   ;;  %v2006_v36 = vld [vmem:[#allocation2 + $0x18] ss:$36 sps:$4 sm:$0xff]   ;;  %vm458_vm5 = vcmask 457728   ;;  %vm514_vm6 = vcmask 48128  }
  0x46   :  { %400 = vrot.lane.b32.xlu1 %v1969_v9, %s2150_s9  ;;  %1573 = vmatprep.subr.bf16.mxu1 %v2260_v11  ;;  %vm587_vm7 = vcmask 687104   ;;  %vm643_vm8 = vcmask 277504   ;;  %vm716_vm9 = vcmask 916480   ;;  %vm772_vm10 = vcmask 506880  }
  0x47   :  { %vm828_vm11 = vcmask 97280   ;;  %vm901_vm12 = vcmask 736256   ;;  %vm957_vm13 = vcmask 326656   ;;  %vm1030_vm14 = vcmask 965632  }
  0x48   :  { %1552 = vmatpush3.bf16.msra.mxu0 %v2265_v13  ;;  %1574 = vmatpush3.bf16.msra.mxu1 %v2265_v13  ;;  %vm1086_vm15 = vcmask 556032  }
  0x49   :  { %396 = vrot.lane.b32.xlu0 %v1970_v12, %s2150_s9  ;;  %1553 = vmatprep.subr.bf16.mxu0 %v2268_v14 }
  0x4a   :  { %454 = vrot.lane.b32.xlu1 %v1967_v7, %s2151_s10  ;;  %1575 = vmatprep.subr.bf16.mxu1 %v2268_v14 }
  0x4c   :  { %1554 = vmatpush3.bf16.msra.mxu0 %v2273_v15  ;;  %1576 = vmatpush3.bf16.msra.mxu1 %v2273_v15 }
  0x4d   :  { %456 = vrot.lane.b32.xlu0 %v1969_v9, %s2151_s10  ;;  %1555 = vmatprep.subr.bf16.mxu0 %v2276_v16 }
  0x4e   :  { %452 = vrot.lane.b32.xlu1 %v1970_v12, %s2151_s10  ;;  %1577 = vmatprep.subr.bf16.mxu1 %v2276_v16 }
  0x50   :  { %1556 = vmatpush3.bf16.msra.mxu0 %v2281_v17  ;;  %1578 = vmatpush3.bf16.msra.mxu1 %v2281_v17 }
  0x51   :  { %510 = vrot.lane.b32.xlu0 %v1967_v7, %s2152_s11  ;;  %1557 = vmatprep.subr.bf16.mxu0 %v2284_v19 }
  0x52   :  { %512 = vrot.lane.b32.xlu1 %v1969_v9, %s2152_s11  ;;  %1579 = vmatprep.subr.bf16.mxu1 %v2284_v19 }
  0x54   :  { %1558 = vmatpush3.bf16.msra.mxu0 %v2287_v20  ;;  %1580 = vmatpush3.bf16.msra.mxu1 %v2287_v20 }
  0x55   :  { %508 = vrot.lane.b32.xlu0 %v1970_v12, %s2152_s11  ;;  %1919 = vmatprep.subr.msk.bf16.mxu0 %vm205_vm1, %v2291_v22 }
  0x56   :  { %583 = vrot.lane.b32.xlu1 %v1975_v18, %s2153_s12  ;;  %1920 = vmatprep.subr.msk.bf16.mxu1 %vm205_vm1, %v2291_v22 }
  0x58   :  { %1560 = vmatpush3.bf16.msra.mxu0 %v2297_v24  ;;  %1582 = vmatpush3.bf16.msra.mxu1 %v2297_v24 }
  0x59   :  { %585 = vrot.lane.b32.xlu0 %v1979_v21, %s2153_s12  ;;  %1589 = vmatprep.subr.bf16.mxu0 %v2239_v3 }
  0x5a   :  { %581 = vrot.lane.b32.xlu1 %v1980_v23, %s2153_s12  ;;  %1611 = vmatprep.subr.bf16.mxu1 %v2239_v3 }
  0x5b   :  { %242 = vmatmul.mubr.bf16.vlgmr.msra.gmra.mrb[0].mxu0 %v2235_v1 }
  0x5c   :  { %1590 = vmatpush3.bf16.msra.mxu0 %v2241_v4 }
  0x5d   :  { %639 = vrot.lane.b32.xlu0 %v1975_v18, %s2154_s13  ;;  %1591 = vmatprep.subr.bf16.mxu0 %v2244_v5 }
  0x5e   :  { %641 = vrot.lane.b32.xlu1 %v1979_v21, %s2154_s13 }
  0x60   :  { %1592 = vmatpush3.bf16.msra.mxu0 %v2247_v6 }
  0x61   :  { %637 = vrot.lane.b32.xlu0 %v1980_v23, %s2154_s13  ;;  %1593 = vmatprep.subr.bf16.mxu0 %v2252_v8 }
  0x62   :  { %712 = vrot.lane.b32.xlu1 %v1991_v25, %s2155_s14 }
  0x64   :  { %1594 = vmatpush3.bf16.msra.mxu0 %v2257_v10 }
  0x65   :  { %714 = vrot.lane.b32.xlu0 %v1993_v26, %s2155_s14  ;;  %1595 = vmatprep.subr.bf16.mxu0 %v2260_v11 }
  0x66   :  { %710 = vrot.lane.b32.xlu1 %v1994_v27, %s2155_s14 }
  0x68   :  { %1596 = vmatpush3.bf16.msra.mxu0 %v2265_v13 }
  0x69   :  { %768 = vrot.lane.b32.xlu0 %v1991_v25, %s2156_s15  ;;  %1597 = vmatprep.subr.bf16.mxu0 %v2268_v14 }
  0x6a   :  { %770 = vrot.lane.b32.xlu1 %v1993_v26, %s2156_s15 }
  0x6c   :  { %1598 = vmatpush3.bf16.msra.mxu0 %v2273_v15 }
  0x6d   :  { %766 = vrot.lane.b32.xlu0 %v1994_v27, %s2156_s15  ;;  %1599 = vmatprep.subr.bf16.mxu0 %v2276_v16 }
  0x6e   :  { %824 = vrot.lane.b32.xlu1 %v1991_v25, %s2157_s16 }
  0x70   :  { %1600 = vmatpush3.bf16.msra.mxu0 %v2281_v17 }
  0x71   :  { %826 = vrot.lane.b32.xlu0 %v1993_v26, %s2157_s16  ;;  %1601 = vmatprep.subr.bf16.mxu0 %v2284_v19 }
  0x72   :  { %822 = vrot.lane.b32.xlu1 %v1994_v27, %s2157_s16 }
  0x74   :  { %1602 = vmatpush3.bf16.msra.mxu0 %v2287_v20 }
  0x75   :  { %897 = vrot.lane.b32.xlu0 %v1995_v28, %s2158_s1  ;;  %1921 = vmatprep.subr.msk.bf16.mxu0 %vm205_vm1, %v2291_v22 }
  0x76   :  { %899 = vrot.lane.b32.xlu1 %v1997_v29, %s2158_s1 }
  0x78   :  { %1604 = vmatpush3.bf16.msra.mxu0 %v2297_v24 }
  0x79   :  { %895 = vrot.lane.b32.xlu0 %v1998_v30, %s2158_s1  ;;  %1633 = vmatprep.subr.bf16.mxu0 %v2239_v3 }
  0x7a   :  { %953 = vrot.lane.b32.xlu1 %v1995_v28, %s2159_s17 }
  0x7d   :  { %955 = vrot.lane.b32.xlu0 %v1997_v29, %s2159_s17 }
  0x7e   :  { %951 = vrot.lane.b32.xlu1 %v1998_v30, %s2159_s17 }
  0x81   :  { %1026 = vrot.lane.b32.xlu0 %v1999_v31, %s2160_s18 }
  0x82   :  { %1028 = vrot.lane.b32.xlu1 %v2001_v32, %s2160_s18 }
  0x85   :  { %1024 = vrot.lane.b32.xlu0 %v2002_v33, %s2160_s18 }
  0x86   :  { %1082 = vrot.lane.b32.xlu1 %v1999_v31, %s2161_s19 }
  0x89   :  { %1084 = vrot.lane.b32.xlu0 %v2001_v32, %s2161_s19 }
  0x8a   :  { %1080 = vrot.lane.b32.xlu1 %v2002_v33, %s2161_s19 }
  0x8d   :  { %1138 = vrot.lane.b32.xlu0 %v1999_v31, %s2162_s20 }
  0x8e   :  { %1140 = vrot.lane.b32.xlu1 %v2001_v32, %s2162_s20 }
  0x91   :  { %1136 = vrot.lane.b32.xlu0 %v2002_v33, %s2162_s20 }
  0x92   :  { %1211 = vrot.lane.b32.xlu1 %v2003_v34, %s2163_s21 }
  0x95   :  { %1213 = vrot.lane.b32.xlu0 %v2005_v35, %s2163_s21 }
  0x96   :  { %1209 = vrot.lane.b32.xlu1 %v2006_v36, %s2163_s21 }
  0xab   :  { %v270_v37 = vpop.permute.xlu0 %269 }
  0xac   :  { %v268_v38 = vpop.permute.xlu1 %267 }
  0xad   :  { %v274_v42 = vsel %vm273_vm2, %v268_v38, %v270_v37 }
  0xaf   :  { %v272_v39 = vpop.permute.xlu0 %271 }
  0xb0   :  { %v326_v40 = vpop.permute.xlu1 %325  ;;  %v275_v41 = vsel %vm273_vm2, %v270_v37, %v272_v39  ;;  %vm1142_vm2 = vcmask 146432  }
  0xb1   :  { %1492 = vmatprep.mubr.msk.bf16.mxu1 %vm201_vm0, %v275_v41 }
  0xb2   :  { %313 = vmatmul.mubr.bf16.vlgmr.msra.gmra.mrb[0].mxu1 %v274_v42 }
  0xb3   :  { %1612 = vmatpush3.bf16.msra.mxu1 %v2241_v4  ;;  %v328_v43 = vpop.permute.xlu0 %327 }
  0xb4   :  { %v331_v44 = vsel %vm329_vm3, %v326_v40, %v328_v43  ;;  %v324_v45 = vpop.permute.xlu1 %323  ;;  %1613 = vmatprep.subr.bf16.mxu1 %v2244_v5 }
  0xb5   :  { %v330_v46 = vsel %vm329_vm3, %v324_v45, %v326_v40  ;;  %1493 = vmatprep.mubr.msk.bf16.mxu0 %vm201_vm0, %v331_v44  ;;  %vm1215_vm3 = vcmask 785408  }
  0xb6   :  { %369 = vmatmul.mubr.bf16.vlgmr.msra.gmra.mrb[4].mxu0 %v330_v46 }
  0xb7   :  { %1614 = vmatpush3.bf16.msra.mxu1 %v2247_v6  ;;  %1634 = vmatpush3.bf16.msra.mxu0 %v2241_v4  ;;  %v399_v47 = vpop.permute.xlu0 %398 }
  0xb8   :  { %1615 = vmatprep.subr.bf16.mxu1 %v2252_v8  ;;  %1635 = vmatprep.subr.bf16.mxu0 %v2244_v5  ;;  %v401_v48 = vpop.permute.xlu1 %400 }
  0xb9   :  { %v404_v49 = vsel %vm402_vm4, %v399_v47, %v401_v48 }
  0xba   :  { %1497 = vmatprep.mubr.msk.bf16.mxu1 %vm201_vm0, %v404_v49 }
  0xbb   :  { %1616 = vmatpush3.bf16.msra.mxu1 %v2257_v10  ;;  %1636 = vmatpush3.bf16.msra.mxu0 %v2247_v6  ;;  %v397_v50 = vpop.permute.xlu0 %396 }
  0xbc   :  { %1617 = vmatprep.subr.bf16.mxu1 %v2260_v11  ;;  %1637 = vmatprep.subr.bf16.mxu0 %v2252_v8  ;;  %v455_v51 = vpop.permute.xlu1 %454  ;;  %v403_v58 = vsel %vm402_vm4, %v397_v50, %v399_v47 }
  0xbf   :  { %1618 = vmatpush3.bf16.msra.mxu1 %v2265_v13  ;;  %1638 = vmatpush3.bf16.msra.mxu0 %v2257_v10  ;;  %v457_v52 = vpop.permute.xlu0 %456 }
  0xc0   :  { %1619 = vmatprep.subr.bf16.mxu1 %v2268_v14  ;;  %1639 = vmatprep.subr.bf16.mxu0 %v2260_v11  ;;  %v460_v53 = vsel %vm458_vm5, %v455_v51, %v457_v52  ;;  %v453_v55 = vpop.permute.xlu1 %452 }
  0xc1   :  { %1498 = vmatprep.mubr.msk.bf16.mxu0 %vm201_vm0, %v460_v53  ;;  %v459_v61 = vsel %vm458_vm5, %v453_v55, %v455_v51 }
  0xc3   :  { %1620 = vmatpush3.bf16.msra.mxu1 %v2273_v15  ;;  %1640 = vmatpush3.bf16.msra.mxu0 %v2265_v13  ;;  %v2352_v54 = vpop.permute.xlu0 %510 }
  0xc4   :  { %1621 = vmatprep.subr.bf16.mxu1 %v2276_v16  ;;  %1641 = vmatprep.subr.bf16.mxu0 %v2268_v14  ;;  %v513_v57 = vpop.permute.xlu1 %512 }
  0xc5   :  { %v516_v59 = vsel %vm514_vm6, %v2352_v54, %v513_v57 }
  0xc7   :  { %1622 = vmatpush3.bf16.msra.mxu1 %v2281_v17  ;;  %1642 = vmatpush3.bf16.msra.mxu0 %v2273_v15  ;;  %v509_v56 = vpop.permute.xlu0 %508 }
  0xc8   :  { %1623 = vmatprep.subr.bf16.mxu1 %v2284_v19  ;;  %1643 = vmatprep.subr.bf16.mxu0 %v2276_v16  ;;  %v584_v62 = vpop.permute.xlu1 %583  ;;  %v515_v9 = vsel %vm514_vm6, %v509_v56, %v2352_v54 }
  0xcb   :  { %1624 = vmatpush3.bf16.msra.mxu1 %v2287_v20  ;;  %1644 = vmatpush3.bf16.msra.mxu0 %v2281_v17  ;;  %v586_v60 = vpop.permute.xlu0 %585 }
  0xcc   :  { %1922 = vmatprep.subr.msk.bf16.mxu1 %vm205_vm1, %v2291_v22  ;;  %1645 = vmatprep.subr.bf16.mxu0 %v2284_v19  ;;  %v589_v63 = vsel %vm587_vm7, %v584_v62, %v586_v60  ;;  %v582_v1 = vpop.permute.xlu1 %581 }
  0xcd   :  { %v588_v21 = vsel %vm587_vm7, %v582_v1, %v584_v62 }
  0xcf   :  { %1626 = vmatpush3.bf16.msra.mxu1 %v2297_v24  ;;  %1646 = vmatpush3.bf16.msra.mxu0 %v2287_v20  ;;  %v2395_v0 = vpop.permute.xlu0 %639 }
  0xd0   :  { %1923 = vmatprep.subr.msk.bf16.mxu0 %vm205_vm1, %v2291_v22  ;;  %1655 = vmatprep.subr.bf16.mxu1 %v2239_v3  ;;  %v642_v7 = vpop.permute.xlu1 %641 }
  0xd1   :  { %v645_v12 = vsel %vm643_vm8, %v2395_v0, %v642_v7 }
  0xd2   :  { %442 = vmatmul.mubr.bf16.vlgmr.msra.gmra.mrb[4].mxu1 %v403_v58 }
  0xd3   :  { %1648 = vmatpush3.bf16.msra.mxu0 %v2297_v24  ;;  %1656 = vmatpush3.bf16.msra.mxu1 %v2241_v4  ;;  %v638_v2 = vpop.permute.xlu0 %637 }
  0xd4   :  { %1657 = vmatprep.subr.bf16.mxu1 %v2244_v5  ;;  %1677 = vmatprep.subr.bf16.mxu0 %v2239_v3  ;;  %v713_v23 = vpop.permute.xlu1 %712  ;;  %v644_v30 = vsel %vm643_vm8, %v638_v2, %v2395_v0  ;;  %v2040_v0 = vld [vmem:[#allocation5] sm:$0xff]   ;;  %v2041_v2 = vld [vmem:[#allocation5 + $0x48] sm:$0xff]  }
  0xd5   :  { %1499 = vmatprep.mubr.msk.bf16.mxu1 %vm201_vm0, %v516_v59 }
  0xd6   :  { %498 = vmatmul.mubr.bf16.vlgmr.msra.gmra.mrb[8].mxu0 %v459_v61 }
  0xd7   :  { %1658 = vmatpush3.bf16.msra.mxu1 %v2247_v6  ;;  %1678 = vmatpush3.bf16.msra.mxu0 %v2241_v4  ;;  %v715_v18 = vpop.permute.xlu0 %714 }
  0xd8   :  { %1659 = vmatprep.subr.bf16.mxu1 %v2252_v8  ;;  %1679 = vmatprep.subr.bf16.mxu0 %v2244_v5  ;;  %v718_v25 = vsel %vm716_vm9, %v713_v23, %v715_v18  ;;  %v711_v27 = vpop.permute.xlu1 %710  ;;  %v2042_v18 = vld [vmem:[#allocation5 + $0x8] sm:$0xff]  }
  0xd9   :  { %1503 = vmatprep.mubr.msk.bf16.mxu0 %vm201_vm0, %v589_v63  ;;  %v717_v33 = vsel %vm716_vm9, %v711_v27, %v713_v23  ;;  %v2044_v23 = vld [vmem:[#allocation5 + $0x10] sm:$0xff]  }
  0xdb   :  { %1660 = vmatpush3.bf16.msra.mxu1 %v2257_v10  ;;  %1680 = vmatpush3.bf16.msra.mxu0 %v2247_v6  ;;  %v2439_v26 = vpop.permute.xlu0 %768 }
  0xdc   :  { %1661 = vmatprep.subr.bf16.mxu1 %v2260_v11  ;;  %1681 = vmatprep.subr.bf16.mxu0 %v2252_v8  ;;  %v771_v29 = vpop.permute.xlu1 %770 }
  0xdd   :  { %v774_v31 = vsel %vm772_vm10, %v2439_v26, %v771_v29 }
  0xdf   :  { %1662 = vmatpush3.bf16.msra.mxu1 %v2265_v13  ;;  %1682 = vmatpush3.bf16.msra.mxu0 %v2257_v10  ;;  %v767_v28 = vpop.permute.xlu0 %766 }
  0xe0   :  { %1663 = vmatprep.subr.bf16.mxu1 %v2268_v14  ;;  %1683 = vmatprep.subr.bf16.mxu0 %v2260_v11  ;;  %v825_v34 = vpop.permute.xlu1 %824  ;;  %v773_v40 = vsel %vm772_vm10, %v767_v28, %v2439_v26 }
  0xe3   :  { %1664 = vmatpush3.bf16.msra.mxu1 %v2273_v15  ;;  %1684 = vmatpush3.bf16.msra.mxu0 %v2265_v13  ;;  %v827_v32 = vpop.permute.xlu0 %826 }
  0xe4   :  { %1665 = vmatprep.subr.bf16.mxu1 %v2276_v16  ;;  %1685 = vmatprep.subr.bf16.mxu0 %v2268_v14  ;;  %v830_v35 = vsel %vm828_vm11, %v825_v34, %v827_v32  ;;  %v823_v37 = vpop.permute.xlu1 %822 }
  0xe5   :  { %v829_v48 = vsel %vm828_vm11, %v823_v37, %v825_v34 }
  0xe7   :  { %1666 = vmatpush3.bf16.msra.mxu1 %v2281_v17  ;;  %1686 = vmatpush3.bf16.msra.mxu0 %v2273_v15  ;;  %v2483_v36 = vpop.permute.xlu0 %897 }
  0xe8   :  { %1667 = vmatprep.subr.bf16.mxu1 %v2284_v19  ;;  %1687 = vmatprep.subr.bf16.mxu0 %v2276_v16  ;;  %v900_v39 = vpop.permute.xlu1 %899 }
  0xe9   :  { %v903_v42 = vsel %vm901_vm12, %v2483_v36, %v900_v39 }
  0xeb   :  { %1668 = vmatpush3.bf16.msra.mxu1 %v2287_v20  ;;  %1688 = vmatpush3.bf16.msra.mxu0 %v2281_v17  ;;  %v896_v38 = vpop.permute.xlu0 %895 }
  0xec   :  { %1924 = vmatprep.subr.msk.bf16.mxu1 %vm205_vm1, %v2291_v22  ;;  %1689 = vmatprep.subr.bf16.mxu0 %v2284_v19  ;;  %v954_v49 = vpop.permute.xlu1 %953  ;;  %v902_v56 = vsel %vm901_vm12, %v896_v38, %v2483_v36 }
  0xef   :  { %1670 = vmatpush3.bf16.msra.mxu1 %v2297_v24  ;;  %1690 = vmatpush3.bf16.msra.mxu0 %v2287_v20  ;;  %v956_v44 = vpop.permute.xlu0 %955 }
  0xf0   :  { %1925 = vmatprep.subr.msk.bf16.mxu0 %vm205_vm1, %v2291_v22  ;;  %1699 = vmatprep.subr.bf16.mxu1 %v2239_v3  ;;  %v959_v51 = vsel %vm957_vm13, %v954_v49, %v956_v44  ;;  %v952_v53 = vpop.permute.xlu1 %951 }
  0xf1   :  { %v958_v59 = vsel %vm957_vm13, %v952_v53, %v954_v49 }
  0xf2   :  { %554 = vmatmul.mubr.bf16.vlgmr.msra.gmra.mrb[8].mxu1 %v515_v9 }
  0xf3   :  { %1692 = vmatpush3.bf16.msra.mxu0 %v2297_v24  ;;  %1700 = vmatpush3.bf16.msra.mxu1 %v2241_v4  ;;  %v2531_v52 = vpop.permute.xlu0 %1026 }
  0xf4   :  { %1701 = vmatprep.subr.bf16.mxu1 %v2244_v5  ;;  %1721 = vmatprep.subr.bf16.mxu0 %v2239_v3  ;;  %v1029_v55 = vpop.permute.xlu1 %1028 }
  0xf5   :  { %1504 = vmatprep.mubr.msk.bf16.mxu1 %vm201_vm0, %v645_v12  ;;  %v1032_v57 = vsel %vm1030_vm14, %v2531_v52, %v1029_v55 }
  0xf6   :  { %627 = vmatmul.mubr.bf16.vlgmr.msra.gmra.mrb[12].mxu0 %v588_v21  ;;  %v2043_v21 = vld [vmem:[#allocation5 + $0x50] sm:$0xff]  }
  0xf7   :  { %1702 = vmatpush3.bf16.msra.mxu1 %v2247_v6  ;;  %1722 = vmatpush3.bf16.msra.mxu0 %v2241_v4  ;;  %v1025_v54 = vpop.permute.xlu0 %1024 }
  0xf8   :  { %1703 = vmatprep.subr.bf16.mxu1 %v2252_v8  ;;  %1723 = vmatprep.subr.bf16.mxu0 %v2244_v5  ;;  %v1083_v60 = vpop.permute.xlu1 %1082  ;;  %v1031_v62 = vsel %vm1030_vm14, %v1025_v54, %v2531_v52 }
  0xf9   :  { %1508 = vmatprep.mubr.msk.bf16.mxu0 %vm201_vm0, %v718_v25 }
  0xfb   :  { %1704 = vmatpush3.bf16.msra.mxu1 %v2257_v10  ;;  %1724 = vmatpush3.bf16.msra.mxu0 %v2247_v6  ;;  %v1085_v58 = vpop.permute.xlu0 %1084 }
  0xfc   :  { %1705 = vmatprep.subr.bf16.mxu1 %v2260_v11  ;;  %1725 = vmatprep.subr.bf16.mxu0 %v2252_v8  ;;  %v1088_v61 = vsel %vm1086_vm15, %v1083_v60, %v1085_v58 }
  0xff   :  { %1706 = vmatpush3.bf16.msra.mxu1 %v2265_v13  ;;  %1726 = vmatpush3.bf16.msra.mxu0 %v2257_v10 }
 0x100   :  { %1707 = vmatprep.subr.bf16.mxu1 %v2268_v14  ;;  %1727 = vmatprep.subr.bf16.mxu0 %v2260_v11 }
 0x103   :  { %1708 = vmatpush3.bf16.msra.mxu1 %v2273_v15  ;;  %1728 = vmatpush3.bf16.msra.mxu0 %v2265_v13 }
 0x104   :  { %1709 = vmatprep.subr.bf16.mxu1 %v2276_v16  ;;  %1729 = vmatprep.subr.bf16.mxu0 %v2268_v14 }
 0x107   :  { %1710 = vmatpush3.bf16.msra.mxu1 %v2281_v17  ;;  %1730 = vmatpush3.bf16.msra.mxu0 %v2273_v15 }
 0x108   :  { %1711 = vmatprep.subr.bf16.mxu1 %v2284_v19  ;;  %1731 = vmatprep.subr.bf16.mxu0 %v2276_v16 }
 0x10b   :  { %1712 = vmatpush3.bf16.msra.mxu1 %v2287_v20  ;;  %1732 = vmatpush3.bf16.msra.mxu0 %v2281_v17 }
 0x10c   :  { %1926 = vmatprep.subr.msk.bf16.mxu1 %vm205_vm1, %v2291_v22  ;;  %1733 = vmatprep.subr.bf16.mxu0 %v2284_v19 }
 0x10f   :  { %1714 = vmatpush3.bf16.msra.mxu1 %v2297_v24  ;;  %1734 = vmatpush3.bf16.msra.mxu0 %v2287_v20 }
 0x110   :  { %1927 = vmatprep.subr.msk.bf16.mxu0 %vm205_vm1, %v2291_v22  ;;  %1743 = vmatprep.subr.bf16.mxu1 %v2239_v3 }
 0x112   :  { %683 = vmatmul.mubr.bf16.vlgmr.msra.gmra.mrb[12].mxu1 %v644_v30 }
 0x113   :  { %1736 = vmatpush3.bf16.msra.mxu0 %v2297_v24  ;;  %1744 = vmatpush3.bf16.msra.mxu1 %v2241_v4 }
 0x114   :  { %1745 = vmatprep.subr.bf16.mxu1 %v2244_v5  ;;  %1765 = vmatprep.subr.bf16.mxu0 %v2239_v3 }
 0x115   :  { %1509 = vmatprep.mubr.msk.bf16.mxu1 %vm201_vm0, %v774_v31 }
 0x116   :  { %756 = vmatmul.mubr.bf16.vlgmr.msra.gmra.mrb[16].mxu0 %v717_v33 }
 0x117   :  { %1746 = vmatpush3.bf16.msra.mxu1 %v2247_v6  ;;  %1766 = vmatpush3.bf16.msra.mxu0 %v2241_v4 }
 0x118   :  { %1747 = vmatprep.subr.bf16.mxu1 %v2252_v8  ;;  %1767 = vmatprep.subr.bf16.mxu0 %v2244_v5 }
 0x119   :  { %1510 = vmatprep.mubr.msk.bf16.mxu0 %vm201_vm0, %v830_v35 }
 0x11b   :  { %1748 = vmatpush3.bf16.msra.mxu1 %v2257_v10  ;;  %1768 = vmatpush3.bf16.msra.mxu0 %v2247_v6 }
 0x11c   :  { %1749 = vmatprep.subr.bf16.mxu1 %v2260_v11  ;;  %1769 = vmatprep.subr.bf16.mxu0 %v2252_v8 }
 0x11f   :  { %1750 = vmatpush3.bf16.msra.mxu1 %v2265_v13  ;;  %1770 = vmatpush3.bf16.msra.mxu0 %v2257_v10 }
 0x120   :  { %1751 = vmatprep.subr.bf16.mxu1 %v2268_v14  ;;  %1771 = vmatprep.subr.bf16.mxu0 %v2260_v11 }
 0x123   :  { %1752 = vmatpush3.bf16.msra.mxu1 %v2273_v15  ;;  %1772 = vmatpush3.bf16.msra.mxu0 %v2265_v13 }
 0x124   :  { %1753 = vmatprep.subr.bf16.mxu1 %v2276_v16  ;;  %1773 = vmatprep.subr.bf16.mxu0 %v2268_v14 }
 0x127   :  { %1754 = vmatpush3.bf16.msra.mxu1 %v2281_v17  ;;  %1774 = vmatpush3.bf16.msra.mxu0 %v2273_v15 }
 0x128   :  { %1755 = vmatprep.subr.bf16.mxu1 %v2284_v19  ;;  %1775 = vmatprep.subr.bf16.mxu0 %v2276_v16 }
 0x12b   :  { %1756 = vmatpush3.bf16.msra.mxu1 %v2287_v20  ;;  %1776 = vmatpush3.bf16.msra.mxu0 %v2281_v17 }
 0x12c   :  { %1928 = vmatprep.subr.msk.bf16.mxu1 %vm205_vm1, %v2291_v22  ;;  %1777 = vmatprep.subr.bf16.mxu0 %v2284_v19 }
 0x12e   :  { %v1561_v41 = vpop.f32.mrb[0].mxu0 }
 0x12f   :  { %1758 = vmatpush3.bf16.msra.mxu1 %v2297_v24  ;;  %1778 = vmatpush3.bf16.msra.mxu0 %v2287_v20  ;;  %v1562_v43 = vpop.f32.mrb[1].mxu0 }
 0x130   :  { %1929 = vmatprep.subr.msk.bf16.mxu0 %vm205_vm1, %v2291_v22  ;;  %1787 = vmatprep.subr.bf16.mxu1 %v2239_v3  ;;  %v2503_v45 = vadd.f32 %v1562_v43, %v1561_v41  ;;  %v1564_v46 = vpop.f32.mrb[2].mxu0 }
 0x131   :  { %v1565_v47 = vpop.f32.mrb[3].mxu0 }
 0x132   :  { %812 = vmatmul.mubr.bf16.vlgmr.msra.gmra.mrb[16].mxu1 %v773_v40  ;;  %v2509_v50 = vadd.f32 %v1565_v47, %v1564_v46 }
 0x133   :  { %1780 = vmatpush3.bf16.msra.mxu0 %v2297_v24  ;;  %1788 = vmatpush3.bf16.msra.mxu1 %v2241_v4 }
 0x134   :  { %1789 = vmatprep.subr.bf16.mxu1 %v2244_v5  ;;  %1809 = vmatprep.subr.bf16.mxu0 %v2239_v3 }
 0x135   :  { %1514 = vmatprep.mubr.msk.bf16.mxu1 %vm201_vm0, %v903_v42 }
 0x136   :  { %868 = vmatmul.mubr.bf16.vlgmr.msra.gmra.mrb[20].mxu0 %v829_v48 }
 0x137   :  { %1790 = vmatpush3.bf16.msra.mxu1 %v2247_v6  ;;  %1810 = vmatpush3.bf16.msra.mxu0 %v2241_v4 }
 0x138   :  { %1791 = vmatprep.subr.bf16.mxu1 %v2252_v8  ;;  %1811 = vmatprep.subr.bf16.mxu0 %v2244_v5 }
 0x139   :  { %1515 = vmatprep.mubr.msk.bf16.mxu0 %vm201_vm0, %v959_v51 }
 0x13b   :  { %1792 = vmatpush3.bf16.msra.mxu1 %v2257_v10  ;;  %1812 = vmatpush3.bf16.msra.mxu0 %v2247_v6 }
 0x13c   :  { %1793 = vmatprep.subr.bf16.mxu1 %v2260_v11  ;;  %1813 = vmatprep.subr.bf16.mxu0 %v2252_v8 }
 0x13f   :  { %1794 = vmatpush3.bf16.msra.mxu1 %v2265_v13  ;;  %1814 = vmatpush3.bf16.msra.mxu0 %v2257_v10 }
 0x140   :  { %1795 = vmatprep.subr.bf16.mxu1 %v2268_v14  ;;  %1815 = vmatprep.subr.bf16.mxu0 %v2260_v11 }
 0x143   :  { %1796 = vmatpush3.bf16.msra.mxu1 %v2273_v15  ;;  %1816 = vmatpush3.bf16.msra.mxu0 %v2265_v13 }
 0x144   :  { %1797 = vmatprep.subr.bf16.mxu1 %v2276_v16  ;;  %1817 = vmatprep.subr.bf16.mxu0 %v2268_v14 }
 0x147   :  { %1798 = vmatpush3.bf16.msra.mxu1 %v2281_v17  ;;  %1818 = vmatpush3.bf16.msra.mxu0 %v2273_v15 }
 0x148   :  { %1799 = vmatprep.subr.bf16.mxu1 %v2284_v19  ;;  %1819 = vmatprep.subr.bf16.mxu0 %v2276_v16 }
 0x14b   :  { %1800 = vmatpush3.bf16.msra.mxu1 %v2287_v20  ;;  %1820 = vmatpush3.bf16.msra.mxu0 %v2281_v17 }
 0x14c   :  { %1930 = vmatprep.subr.msk.bf16.mxu1 %vm205_vm1, %v2291_v22  ;;  %1821 = vmatprep.subr.bf16.mxu0 %v2284_v19 }
 0x14f   :  { %1802 = vmatpush3.bf16.msra.mxu1 %v2297_v24  ;;  %1822 = vmatpush3.bf16.msra.mxu0 %v2287_v20 }
 0x150   :  { %1931 = vmatprep.subr.msk.bf16.mxu0 %vm205_vm1, %v2291_v22  ;;  %1831 = vmatprep.subr.bf16.mxu1 %v2239_v3 }
 0x152   :  { %941 = vmatmul.mubr.bf16.vlgmr.msra.gmra.mrb[20].mxu1 %v902_v56 }
 0x153   :  { %1824 = vmatpush3.bf16.msra.mxu0 %v2297_v24  ;;  %1832 = vmatpush3.bf16.msra.mxu1 %v2241_v4 }
 0x154   :  { %1833 = vmatprep.subr.bf16.mxu1 %v2244_v5  ;;  %1853 = vmatprep.subr.bf16.mxu0 %v2239_v3  ;;  %v2575_v3 = vpop.permute.xlu0 %1138 }
 0x155   :  { %1519 = vmatprep.mubr.msk.bf16.mxu1 %vm201_vm0, %v1032_v57 }
 0x156   :  { %997 = vmatmul.mubr.bf16.vlgmr.msra.gmra.mrb[24].mxu0 %v958_v59 }
 0x157   :  { %1834 = vmatpush3.bf16.msra.mxu1 %v2247_v6  ;;  %1854 = vmatpush3.bf16.msra.mxu0 %v2241_v4  ;;  %v1081_v4 = vpop.permute.xlu1 %1080 }
 0x158   :  { %1835 = vmatprep.subr.bf16.mxu1 %v2252_v8  ;;  %1855 = vmatprep.subr.bf16.mxu0 %v2244_v5  ;;  %v2584_v5 = vpop.permute.xlu0 %1136  ;;  %v1087_v7 = vsel %vm1086_vm15, %v1081_v4, %v1083_v60 }
 0x159   :  { %1520 = vmatprep.mubr.msk.bf16.mxu0 %vm201_vm0, %v1088_v61 }
 0x15b   :  { %1836 = vmatpush3.bf16.msra.mxu1 %v2257_v10  ;;  %1856 = vmatpush3.bf16.msra.mxu0 %v2247_v6  ;;  %v1141_v6 = vpop.permute.xlu1 %1140 }
 0x15c   :  { %1837 = vmatprep.subr.bf16.mxu1 %v2260_v11  ;;  %1857 = vmatprep.subr.bf16.mxu0 %v2252_v8  ;;  %v2039_v8 = vld [vmem:[#allocation5 + $0x40] sm:$0xff]   ;;  %v1144_v63 = vsel %vm1142_vm2, %v2575_v3, %v1141_v6  ;;  %v1214_v1 = vpop.permute.xlu0 %1213 }
 0x15d   :  { %v2007_v6 = vld [vmem:[#allocation7] ss:$8 sps:$4 sm:$0xff]  }
 0x15f   :  { %1838 = vmatpush3.bf16.msra.mxu1 %v2265_v13  ;;  %1858 = vmatpush3.bf16.msra.mxu0 %v2257_v10  ;;  %v1212_v9 = vpop.permute.xlu1 %1211 }
 0x160   :  { %1839 = vmatprep.subr.bf16.mxu1 %v2268_v14  ;;  %1859 = vmatprep.subr.bf16.mxu0 %v2260_v11  ;;  %v1217_v12 = vsel %vm1215_vm3, %v1212_v9, %v1214_v1  ;;  %v2013_v1 = vld [vmem:[#allocation7 + $0x20] ss:$8 sps:$4 sm:$0xff]  }
 0x163   :  { %1840 = vmatpush3.bf16.msra.mxu1 %v2273_v15  ;;  %1860 = vmatpush3.bf16.msra.mxu0 %v2265_v13  ;;  %v1210_v35 = vpop.permute.xlu1 %1209 }
 0x164   :  { %1841 = vmatprep.subr.bf16.mxu1 %v2276_v16  ;;  %1861 = vmatprep.subr.bf16.mxu0 %v2268_v14 }
 0x167   :  { %1842 = vmatpush3.bf16.msra.mxu1 %v2281_v17  ;;  %1862 = vmatpush3.bf16.msra.mxu0 %v2273_v15 }
 0x168   :  { %1843 = vmatprep.subr.bf16.mxu1 %v2284_v19  ;;  %1863 = vmatprep.subr.bf16.mxu0 %v2276_v16 }
 0x16b   :  { %1844 = vmatpush3.bf16.msra.mxu1 %v2287_v20  ;;  %1864 = vmatpush3.bf16.msra.mxu0 %v2281_v17 }
 0x16c   :  { %1932 = vmatprep.subr.msk.bf16.mxu1 %vm205_vm1, %v2291_v22  ;;  %1865 = vmatprep.subr.bf16.mxu0 %v2284_v19 }
 0x16f   :  { %1846 = vmatpush3.bf16.msra.mxu1 %v2297_v24  ;;  %1866 = vmatpush3.bf16.msra.mxu0 %v2287_v20 }
 0x170   :  { %1933 = vmatprep.subr.msk.bf16.mxu0 %vm205_vm1, %v2291_v22  ;;  %1875 = vmatprep.subr.bf16.mxu1 %v2039_v8 }
 0x172   :  { %1070 = vmatmul.mubr.bf16.vlgmr.msra.gmra.mrb[24].mxu1 %v1031_v62  ;;  %v2012_v62 = vld [vmem:[#allocation7 + $0x14] ss:$8 sps:$4 sm:$0xff]  }
 0x173   :  { %1868 = vmatpush3.bf16.msra.mxu0 %v2297_v24  ;;  %1876 = vmatpush3.bf16.msra.mxu1 %v2040_v0 }
 0x174   :  { %1877 = vmatprep.subr.bf16.mxu1 %v2041_v2  ;;  %1897 = vmatprep.subr.bf16.mxu0 %v2039_v8  ;;  %v2009_v8 = vld [vmem:[#allocation7 + $0x4] ss:$8 sps:$4 sm:$0xff]  }
 0x175   :  { %1521 = vmatprep.mubr.msk.bf16.mxu1 %vm201_vm0, %v1144_v63  ;;  %v2010_v63 = vld [vmem:[#allocation7 + $0x10] ss:$8 sps:$4 sm:$0xff]  }
 0x176   :  { %1126 = vmatmul.mubr.bf16.vlgmr.msra.gmra.mrb[28].mxu0 %v1087_v7  ;;  %v2016_v7 = vld [vmem:[#allocation7 + $0x30] ss:$8 sps:$4 sm:$0xff]  }
 0x177   :  { %1878 = vmatpush3.bf16.msra.mxu1 %v2042_v18  ;;  %1898 = vmatpush3.bf16.msra.mxu0 %v2040_v0  ;;  %v2015_v0 = vld [vmem:[#allocation7 + $0x24] ss:$8 sps:$4 sm:$0xff]  }
 0x178   :  { %1879 = vmatprep.subr.bf16.mxu1 %v2043_v21  ;;  %1899 = vmatprep.subr.bf16.mxu0 %v2041_v2  ;;  %v2018_v2 = vld [vmem:[#allocation7 + $0x34] ss:$8 sps:$4 sm:$0xff]  }
 0x179   :  { %1525 = vmatprep.mubr.msk.bf16.mxu0 %vm201_vm0, %v1217_v12  ;;  %v2021_v12 = vld [vmem:[#allocation7 + $0x44] ss:$8 sps:$4 sm:$0xff]  }
 0x17b   :  { %1880 = vmatpush3.bf16.msra.mxu1 %v2257_v10  ;;  %1900 = vmatpush3.bf16.msra.mxu0 %v2042_v18 }
 0x17c   :  { %1881 = vmatprep.subr.bf16.mxu1 %v2260_v11  ;;  %1901 = vmatprep.subr.bf16.mxu0 %v2043_v21  ;;  %v2019_v21 = vld [vmem:[#allocation7 + $0x40] ss:$8 sps:$4 sm:$0xff]  }
 0x17f   :  { %1882 = vmatpush3.bf16.msra.mxu1 %v2265_v13  ;;  %1902 = vmatpush3.bf16.msra.mxu0 %v2044_v23 }
 0x180   :  { %1883 = vmatprep.subr.bf16.mxu1 %v2268_v14  ;;  %1903 = vmatprep.subr.bf16.mxu0 %v2260_v11 }
 0x183   :  { %1884 = vmatpush3.bf16.msra.mxu1 %v2273_v15  ;;  %1904 = vmatpush3.bf16.msra.mxu0 %v2265_v13 }
 0x184   :  { %1885 = vmatprep.subr.bf16.mxu1 %v2276_v16  ;;  %1905 = vmatprep.subr.bf16.mxu0 %v2268_v14 }
 0x185   :  { %v1583_v10 = vpop.f32.mrb[0].mxu1 }
 0x186   :  { %v1584_v25 = vpop.f32.mrb[1].mxu1 }
 0x187   :  { %v1585_v26 = vadd.f32 %v1584_v25, %v1583_v10  ;;  %1886 = vmatpush3.bf16.msra.mxu1 %v2281_v17  ;;  %1906 = vmatpush3.bf16.msra.mxu0 %v2273_v15  ;;  %v1586_v27 = vpop.f32.mrb[2].mxu1 }
 0x188   :  { %v1587_v28 = vpop.f32.mrb[3].mxu1  ;;  %1887 = vmatprep.subr.bf16.mxu1 %v2284_v19  ;;  %1907 = vmatprep.subr.bf16.mxu0 %v2276_v16 }
 0x189   :  { %v321_v11 = vmax.f32 %v2503_v45, %v1585_v26  ;;  %v1588_v13 = vadd.f32 %v1587_v28, %v1586_v27  ;;  %v1605_v29 = vpop.f32.mrb[4].mxu0 }
 0x18a   :  { %v1606_v30 = vpop.f32.mrb[5].mxu0 }
 0x18b   :  { %v322_v14 = vmax.f32 %v2509_v50, %v1588_v13  ;;  %v1607_v31 = vadd.f32 %v1606_v30, %v1605_v29  ;;  %1888 = vmatpush3.bf16.msra.mxu1 %v2287_v20  ;;  %1908 = vmatpush3.bf16.msra.mxu0 %v2281_v17  ;;  %v1608_v32 = vpop.f32.mrb[6].mxu0  ;;  %v1143_v17 = vsel %vm1142_vm2, %v2584_v5, %v2575_v3  ;;  %v2022_v29 = vld [vmem:[#allocation7 + $0x50] ss:$8 sps:$4 sm:$0xff]  }
 0x18c   :  { %v1609_v15 = vpop.f32.mrb[7].mxu0  ;;  %1934 = vmatprep.subr.msk.bf16.mxu1 %vm205_vm1, %v2291_v22  ;;  %1909 = vmatprep.subr.bf16.mxu0 %v2284_v19  ;;  %v1216_v19 = vsel %vm1215_vm3, %v1210_v35, %v1212_v9  ;;  %v2030_v35 = vld [vmem:[#allocation7 + $0x74] ss:$8 sps:$4 sm:$0xff]  }
 0x18d   :  { %v377_v16 = vmax.f32 %v321_v11, %v1607_v31  ;;  %v1610_v33 = vadd.f32 %v1609_v15, %v1608_v32  ;;  %v2024_v11 = vld [vmem:[#allocation7 + $0x54] ss:$8 sps:$4 sm:$0xff]  }
 0x18f   :  { %v378_v34 = vmax.f32 %v322_v14, %v1610_v33  ;;  %1890 = vmatpush3.bf16.msra.mxu1 %v2297_v24  ;;  %1910 = vmatpush3.bf16.msra.mxu0 %v2287_v20  ;;  %v2027_v33 = vld [vmem:[#allocation7 + $0x64] ss:$8 sps:$4 sm:$0xff]  }
 0x190   :  { %1935 = vmatprep.subr.msk.bf16.mxu0 %vm205_vm1, %v2291_v22  ;;  %1385 = vmatprep.subr.bf16.mxu1 %v2009_v8 }
 0x192   :  { %1182 = vmatmul.mubr.bf16.vlgmr.msra.gmra.mrb[28].mxu1 %v1143_v17 }
 0x193   :  { %1912 = vmatpush3.bf16.msra.mxu0 %v2297_v24  ;;  %1386 = vmatpush1.bf16.msra.mxu1 %v2007_v6 }
 0x194   :  { %1387 = vmatprep.subr.bf16.mxu1 %v2012_v62 }
 0x196   :  { %1255 = vmatmul.mubr.bf16.vlgmr.msra.gmra.mrb[32].mxu0 %v1216_v19  ;;  %v2028_v19 = vld [vmem:[#allocation7 + $0x70] ss:$8 sps:$4 sm:$0xff]  }
 0x197   :  { %1388 = vmatpush1.bf16.msra.mxu1 %v2010_v63 }
 0x198   :  { %1389 = vmatprep.subr.bf16.mxu1 %v2015_v0 }
 0x19b   :  { %1390 = vmatpush1.bf16.msra.mxu1 %v2013_v1 }
 0x19c   :  { %1391 = vmatprep.subr.bf16.mxu1 %v2018_v2 }
 0x19f   :  { %1392 = vmatpush1.bf16.msra.mxu1 %v2016_v7 }
 0x1a0   :  { %1393 = vmatprep.subr.bf16.mxu1 %v2021_v12 }
 0x1a3   :  { %1394 = vmatpush1.bf16.msra.mxu1 %v2019_v21 }
 0x1a4   :  { %1395 = vmatprep.subr.bf16.mxu1 %v2024_v11 }
 0x1a5   :  { %v1627_v36 = vpop.f32.mrb[4].mxu1 }
 0x1a6   :  { %v1628_v37 = vpop.f32.mrb[5].mxu1 }
 0x1a7   :  { %v1629_v38 = vadd.f32 %v1628_v37, %v1627_v36  ;;  %v1630_v39 = vpop.f32.mrb[6].mxu1  ;;  %1396 = vmatpush1.bf16.msra.mxu1 %v2022_v29  ;;  %v2164_v36 = vmov 0  }
 0x1a8   :  { %v1631_v40 = vpop.f32.mrb[7].mxu1  ;;  %1397 = vmatprep.subr.bf16.mxu1 %v2027_v33  ;;  %1417 = vmatprep.mubr.bf16.mxu1 %v2164_v36 }
 0x1a9   :  { %v450_v20 = vmax.f32 %v377_v16, %v1629_v38  ;;  %v1632_v41 = vadd.f32 %v1631_v40, %v1630_v39  ;;  %v1649_v42 = vpop.f32.mrb[8].mxu0 }
 0x1aa   :  { %v1650_v22 = vpop.f32.mrb[9].mxu0 }
 0x1ab   :  { %v451_v43 = vmax.f32 %v378_v34, %v1632_v41  ;;  %v1651_v44 = vadd.f32 %v1650_v22, %v1649_v42  ;;  %v1652_v45 = vpop.f32.mrb[10].mxu0  ;;  %v2025_v34 = vld [vmem:[#allocation7 + $0x60] ss:$8 sps:$4 sm:$0xff]  }
 0x1ac   :  { %v1653_v46 = vpop.f32.mrb[11].mxu0  ;;  %1398 = vmatpush1.bf16.msra.mxu1 %v2025_v34 }
 0x1ad   :  { %v506_v47 = vmax.f32 %v450_v20, %v1651_v44  ;;  %v1654_v48 = vadd.f32 %v1653_v46, %v1652_v45  ;;  %1399 = vmatprep.subr.bf16.mxu1 %v2030_v35 }
 0x1af   :  { %v507_v49 = vmax.f32 %v451_v43, %v1654_v48 }
 0x1b0   :  { %1400 = vmatpush1.bf16.msra.mxu1 %v2028_v19 }
 0x1c5   :  { %v1671_v24 = vpop.f32.mrb[8].mxu1 }
 0x1c6   :  { %v1672_v50 = vpop.f32.mrb[9].mxu1 }
 0x1c7   :  { %v1673_v51 = vadd.f32 %v1672_v50, %v1671_v24  ;;  %v1674_v52 = vpop.f32.mrb[10].mxu1 }
 0x1c8   :  { %v1675_v53 = vpop.f32.mrb[11].mxu1 }
 0x1c9   :  { %v562_v54 = vmax.f32 %v506_v47, %v1673_v51  ;;  %v1676_v55 = vadd.f32 %v1675_v53, %v1674_v52  ;;  %v1693_v56 = vpop.f32.mrb[12].mxu0 }
 0x1ca   :  { %v1694_v57 = vpop.f32.mrb[13].mxu0 }
 0x1cb   :  { %v563_v58 = vmax.f32 %v507_v49, %v1676_v55  ;;  %v1695_v59 = vadd.f32 %v1694_v57, %v1693_v56  ;;  %v1696_v60 = vpop.f32.mrb[14].mxu0 }
 0x1cc   :  { %v1697_v61 = vpop.f32.mrb[15].mxu0 }
 0x1cd   :  { %v635_v3 = vmax.f32 %v562_v54, %v1695_v59  ;;  %v1698_v4 = vadd.f32 %v1697_v61, %v1696_v60 }
 0x1cf   :  { %v636_v5 = vmax.f32 %v563_v58, %v1698_v4 }
 0x1e5   :  { %v1715_v9 = vpop.f32.mrb[12].mxu1 }
 0x1e6   :  { %v1716_v18 = vpop.f32.mrb[13].mxu1 }
 0x1e7   :  { %v1717_v23 = vadd.f32 %v1716_v18, %v1715_v9  ;;  %v1718_v10 = vpop.f32.mrb[14].mxu1 }
 0x1e8   :  { %v1719_v25 = vpop.f32.mrb[15].mxu1 }
 0x1e9   :  { %v691_v26 = vmax.f32 %v635_v3, %v1717_v23  ;;  %v1720_v27 = vadd.f32 %v1719_v25, %v1718_v10  ;;  %v1737_v28 = vpop.f32.mrb[16].mxu0 }
 0x1ea   :  { %v1738_v13 = vpop.f32.mrb[17].mxu0 }
 0x1eb   :  { %v692_v30 = vmax.f32 %v636_v5, %v1720_v27  ;;  %v1739_v14 = vadd.f32 %v1738_v13, %v1737_v28  ;;  %v1740_v31 = vpop.f32.mrb[18].mxu0 }
 0x1ec   :  { %v1741_v32 = vpop.f32.mrb[19].mxu0 }
 0x1ed   :  { %v764_v15 = vmax.f32 %v691_v26, %v1739_v14  ;;  %v1742_v16 = vadd.f32 %v1741_v32, %v1740_v31 }
 0x1ef   :  { %v765_v17 = vmax.f32 %v692_v30, %v1742_v16 }
 0x205   :  { %v1759_v37 = vpop.f32.mrb[16].mxu1 }
 0x206   :  { %v1760_v38 = vpop.f32.mrb[17].mxu1 }
 0x207   :  { %v1761_v39 = vadd.f32 %v1760_v38, %v1759_v37  ;;  %v1762_v40 = vpop.f32.mrb[18].mxu1 }
 0x208   :  { %v1763_v20 = vpop.f32.mrb[19].mxu1 }
 0x209   :  { %v820_v41 = vmax.f32 %v764_v15, %v1761_v39  ;;  %v1764_v42 = vadd.f32 %v1763_v20, %v1762_v40  ;;  %v1781_v22 = vpop.f32.mrb[20].mxu0 }
 0x20a   :  { %v1782_v43 = vpop.f32.mrb[21].mxu0 }
 0x20b   :  { %v821_v44 = vmax.f32 %v765_v17, %v1764_v42  ;;  %v1783_v45 = vadd.f32 %v1782_v43, %v1781_v22  ;;  %v1784_v46 = vpop.f32.mrb[22].mxu0  ;;  %v1526_v17 = vld [vmem:[%s2651_s2] ss:$0 sm:$0xff]  ;;  %v1295_v42 = vlaneseq  ;;  %s2165_s2 = smov [#allocation8]  }
 0x20c   :  { %v1785_v47 = vpop.f32.mrb[23].mxu0 }
 0x20d   :  { %v876_v48 = vmax.f32 %v820_v41, %v1783_v45  ;;  %v1786_v49 = vadd.f32 %v1785_v47, %v1784_v46  ;;  %v1296_v22 = vshrl.u32 %v1295_v42, 7 }
 0x20f   :  { %v877_v24 = vmax.f32 %v821_v44, %v1786_v49  ;;  %v1301_v43 = vsub.s32 1, %v1296_v22  ;;  %v1293_v44 = vld [vmem:[%s2653_s4] sm:$0x3]  ;;  %s1457_s4 = sshll.u32 %s2165_s2, 4  ;;  %s1458_s4 = int_to_ptr.vmem [resolvable:$true] %s1457_s4 }
 0x210   :  { %s2111_s26 = scalar_lea.vmem %s1458_s4, 256  ;;  %p2116_p11 = scmp.lt.s32.totalorder %s1458_s4, %s1458_s4 }
 0x211   :  { %v1302_v45 = vrot.slane %v1293_v44, %v1301_v43  ;;  %p2112_p10 = scmp.ne.s32.totalorder %s1458_s4, %s2111_s26  ;;  %p2117_p12 = scmp.lt.s32.totalorder %s2111_s26, %s2111_s26 }
 0x213   :  { %p2118_p13 = por %p2117_p12, %p2116_p11 }
 0x215   :  { %p2119_p0 = pnand %p2118_p13, %p2112_p10 }
 0x225   :  { %v1803_v50 = vpop.f32.mrb[20].mxu1 }
 0x226   :  { %v1804_v51 = vpop.f32.mrb[21].mxu1 }
 0x227   :  { %v1805_v52 = vadd.f32 %v1804_v51, %v1803_v50  ;;  %v1806_v53 = vpop.f32.mrb[22].mxu1 }
 0x228   :  { %v1807_v54 = vpop.f32.mrb[23].mxu1 }
 0x229   :  { %v949_v55 = vmax.f32 %v876_v48, %v1805_v52  ;;  %v1808_v56 = vadd.f32 %v1807_v54, %v1806_v53  ;;  %v1825_v57 = vpop.f32.mrb[24].mxu0  ;;  %v1297_v54 = vsub.s32 0, %v1296_v22 }
 0x22a   :  { %v1826_v58 = vpop.f32.mrb[25].mxu0 }
 0x22b   :  { %v950_v59 = vmax.f32 %v877_v24, %v1808_v56  ;;  %v1827_v60 = vadd.f32 %v1826_v58, %v1825_v57  ;;  %v1828_v61 = vpop.f32.mrb[26].mxu0  ;;  %v1298_v58 = vrot.slane %v1293_v44, %v1297_v54 }
 0x22c   :  { %v1829_v3 = vpop.f32.mrb[27].mxu0 }
 0x22d   :  { %v1005_v4 = vmax.f32 %v949_v55, %v1827_v60  ;;  %v1830_v5 = vadd.f32 %v1829_v3, %v1828_v61 }
 0x22f   :  { %v1006_v6 = vmax.f32 %v950_v59, %v1830_v5 }
 0x245   :  { %v1847_v8 = vpop.f32.mrb[24].mxu1 }
 0x246   :  { %v1848_v62 = vpop.f32.mrb[25].mxu1 }
 0x247   :  { %v1849_v63 = vadd.f32 %v1848_v62, %v1847_v8  ;;  %v1850_v0 = vpop.f32.mrb[26].mxu1 }
 0x248   :  { %v1851_v1 = vpop.f32.mrb[27].mxu1 }
 0x249   :  { %v1078_v2 = vmax.f32 %v1005_v4, %v1849_v63  ;;  %v1852_v7 = vadd.f32 %v1851_v1, %v1850_v0  ;;  %v1869_v9 = vpop.f32.mrb[28].mxu0 }
 0x24a   :  { %v1870_v12 = vpop.f32.mrb[29].mxu0 }
 0x24b   :  { %v1079_v18 = vmax.f32 %v1006_v6, %v1852_v7  ;;  %v1871_v21 = vadd.f32 %v1870_v12, %v1869_v9  ;;  %v1872_v23 = vpop.f32.mrb[30].mxu0 }
 0x24c   :  { %v1873_v10 = vpop.f32.mrb[31].mxu0 }
 0x24d   :  { %v1134_v25 = vmax.f32 %v1078_v2, %v1871_v21  ;;  %v1874_v26 = vadd.f32 %v1873_v10, %v1872_v23 }
 0x24f   :  { %v1135_v27 = vmax.f32 %v1079_v18, %v1874_v26 }
 0x265   :  { %v1891_v28 = vpop.f32.mrb[28].mxu1 }
 0x266   :  { %v1892_v11 = vpop.f32.mrb[29].mxu1 }
 0x267   :  { %v1893_v13 = vadd.f32 %v1892_v11, %v1891_v28  ;;  %v1894_v29 = vpop.f32.mrb[30].mxu1 }
 0x268   :  { %v1895_v30 = vpop.f32.mrb[31].mxu1 }
 0x269   :  { %v1190_v14 = vmax.f32 %v1134_v25, %v1893_v13  ;;  %v1896_v31 = vadd.f32 %v1895_v30, %v1894_v29  ;;  %v1913_v32 = vpop.f32.mrb[32].mxu0 }
 0x26a   :  { %v1914_v15 = vpop.f32.mrb[33].mxu0 }
 0x26b   :  { %v1191_v16 = vmax.f32 %v1135_v27, %v1896_v31  ;;  %v1915_v33 = vadd.f32 %v1914_v15, %v1913_v32  ;;  %v1916_v34 = vpop.f32.mrb[34].mxu0 }
 0x26c   :  { %v1917_v35 = vpop.f32.mrb[35].mxu0 }
 0x26d   :  { %v1263_v19 = vmax.f32 %v1190_v14, %v1915_v33  ;;  %v1918_v36 = vadd.f32 %v1917_v35, %v1916_v34 }
 0x26f   :  { %v1272_v37 = vadd.f32 %v1526_v17, %v1263_v19  ;;  %v1264_v38 = vmax.f32 %v1191_v16, %v1918_v36 }
 0x271   :  { %v1273_v39 = vadd.f32 %v1526_v17, %v1264_v38  ;;  %v1274_v40 = vmax.f32 %v1272_v37, 0.0 }
 0x273   :  { %v1275_v20 = vmax.f32 %v1273_v39, 0.0 }
 0x275   :  { %v1276_v41 = vpack.c.bf16 %v1275_v20, %v1274_v40 }
 0x277   :  { %1418 = vmatmul.mubr.bf16.vlgmr.msra.gmra.mrb[32].mxu1 %v1276_v41 }
 0x34a   :  { %v1419_v46 = vpop.f32.mrb[32].mxu1 }
 0x34b   :  { %v1421_v47 = vpop.f32.mrb[33].mxu1  ;;  %v1420_v59 = vadd.f32 %v1419_v46, %v1298_v58 }
 0x34c   :  { %v1422_v48 = vadd.f32 %v1421_v47, %v1302_v45  ;;  %v1423_v49 = vpop.f32.mrb[34].mxu1 }
 0x34d   :  { %v1425_v24 = vpop.f32.mrb[35].mxu1  ;;  %v1424_v60 = vadd.f32 %v1423_v49, %v1298_v58  ;;  %v1428_v61 = vmax.f32 %v1420_v59, 0.0 }
 0x34e   :  { %v1543_v50 = vmul.f32 -1.442695, %v1422_v48  ;;  %v1426_v51 = vadd.f32 %v1425_v24, %v1302_v45 }
 0x34f   :  { %v1429_v4 = vmax.f32 %v1424_v60, 0.0 }
 0x350   :  { %2031 = vpow2.f32 %v1543_v50  ;;  %v1544_v52 = vmul.f32 -1.442695, %v1426_v51 }
 0x352   :  { %2033 = vpow2.f32 %v1544_v52 }
 0x35a   :  { %v2032_v53 = vpop.eup %2031 }
 0x35b   :  { %v1436_v55 = vadd.f32 1.0, %v2032_v53 }
 0x35c   :  { %v2034_v56 = vpop.eup %2033 }
 0x35d   :  { %2035 = vrcp.f32 %v1436_v55  ;;  %v1437_v57 = vadd.f32 1.0, %v2034_v56 }
 0x35f   :  { %2037 = vrcp.f32 %v1437_v57 }
 0x367   :  { %v2036_v3 = vpop.eup %2035 }
 0x368   :  { %v1442_v5 = vmul.f32 %v2036_v3, %v1428_v61  ;;  %v1444_v6 = vsub.f32 1.0, %v2036_v3 }
 0x369   :  { %v2038_v8 = vpop.eup %2037 }
 0x36a   :  { %v1443_v62 = vmul.f32 %v2038_v8, %v1429_v4  ;;  %v1445_v63 = vsub.f32 1.0, %v2038_v8  ;;  %v1446_v0 = vmul.f32 %v1444_v6, %v1274_v40 }
 0x36c   :  { %v1447_v1 = vmul.f32 %v1445_v63, %v1275_v20  ;;  %v1448_v2 = vadd.f32 %v1446_v0, %v1442_v5 }
 0x36e   :  { %v1449_v7 = vadd.f32 %v1447_v1, %v1443_v62  ;;  %1450 = vst [vmem:[#allocation8] sm:$0xff] %v1448_v2 }
 0x370   :  { %1451 = vst [vmem:[#allocation8 + $0x8] sm:$0xff] %v1449_v7 }
 0x371   :  { %2122 = shalt.err (!%p2119_p0)
}
 0x372   :  { %s2123_s29 = scalar_lea.hbm %s2654_s5, 256 }
 0x373   :  { %p2124_p1 = scmp.ne.s32.totalorder %s2654_s5, %s2123_s29  ;;  %p2127_p2 = scmp.lt.u32.totalorder %s2123_s29, %s2654_s5 }
 0x375   :  { %p2129_p3 = pnand %p2127_p2, %p2124_p1 }
 0x377   :  { %2132 = shalt.err (!%p2129_p3)
}
 0x378   :  { %1463 = dma.vmem_to_hbm [thread:$0]  %s1458_s4, 256, %s2654_s5, [#allocation4], %s2146_s0, %s2146_s0, %s2147_s30  }
 0x379   :  { %2137 = dma.done.wait [#allocation4], 256  }
 0x37a   :  { %2138 = vsyncadd [#allocation4], 4294967040 }
 0x37b   :  { %1467 = vsyncpa [#allocation3], 1 }
 0x37c   :  { %1468 = vsyncpa [#allocation6], 1 }
 0x37d   :  { %1469 = vsyncpa [#allocation4], 1 }

</bundles_post_ra>
